<compile_context>
chip_gen: v7x
topology: tpu7x:2x2x1
jax: 0.10.0
libtpu: 0.0.40
codegen_flags: <defaults>
</compile_context>

<pallas_src>
import functools
import math

import jax
import jax.numpy as jnp
from jax.experimental import pallas as pl
from jax.experimental.pallas import tpu as pltpu


# ------------------------------------------------------------------ small helpers

_SINGLE_BUFFER_WEIGHTS = False  # set by _probe_single_buffering() in __main__


def _probe_single_buffering():
    """Check whether pipeline_mode=pl.Buffered(1) is accepted for constant-index blocks."""
    def k(w_ref, o_ref):
        o_ref[...] = w_ref[...] + 1.0
    try:
        f = pl.pallas_call(
            k,
            out_shape=jax.ShapeDtypeStruct((16, 128), jnp.float32),
            grid=(2,),
            in_specs=[pl.BlockSpec((8, 128), lambda i: (0, 0),
                                   pipeline_mode=pl.Buffered(1))],
            out_specs=pl.BlockSpec((8, 128), lambda i: (i, 0)),
        )
        jax.block_until_ready(f(jnp.zeros((8, 128), jnp.float32)))
        return True
    except Exception:
        return False


def _const_spec(block_shape, index_map):
    """BlockSpec for a block whose index never changes (weights/biases): single-buffer it."""
    if _SINGLE_BUFFER_WEIGHTS:
        return pl.BlockSpec(block_shape, index_map, pipeline_mode=pl.Buffered(1))
    return pl.BlockSpec(block_shape, index_map)


def _vmem_limit(blocks, headroom=2.0, floor=16 << 20, ceil=48 << 20):
    """Explicit scoped-VMEM request: per-step block bytes x double-buffering x headroom
    (for compiler scratch / intermediates), clamped to stay under v7x's 64 MiB physical."""
    per_step = sum(math.prod(s) * jnp.dtype(d).itemsize for s, d in blocks)
    return int(max(floor, min(ceil, 2 * headroom * per_step)))


def _layernorm_f32(x, gamma, beta, eps):
    mean = jnp.mean(x, axis=-1, keepdims=True)
    var = jnp.mean((x - mean) ** 2, axis=-1, keepdims=True)
    return (x - mean) * jax.lax.rsqrt(var + eps) * gamma + beta


# ------------------------------------------------------------------ proj_dec linear

def _linear_kernel(x_ref, w_ref, b_ref, o_ref):
    x = x_ref[...].astype(jnp.bfloat16)
    w = w_ref[...].astype(jnp.bfloat16)
    y = jnp.dot(x, w, preferred_element_type=jnp.float32) + b_ref[...]
    o_ref[...] = y.astype(o_ref.dtype)


def linear_pallas(x, w, b, tm_max=512):
    """Row-tiled x @ w + b. Weight/bias block index is constant -> VMEM-resident."""
    din, dout = w.shape
    lead = x.shape[:-1]
    x2 = x.reshape(-1, din)
    m = x2.shape[0]
    tm = m if m <= tm_max else tm_max
    vmem = _vmem_limit([((tm, din), x.dtype), ((din, dout), w.dtype),
                        ((1, dout), jnp.float32), ((tm, dout), x.dtype)])
    out = pl.pallas_call(
        _linear_kernel,
        out_shape=jax.ShapeDtypeStruct((m, dout), x.dtype),
        grid=(pl.cdiv(m, tm),),
        in_specs=[
            pl.BlockSpec((tm, din), lambda i: (i, 0)),
            _const_spec((din, dout), lambda i: (0, 0)),
            _const_spec((1, dout), lambda i: (0, 0)),
        ],
        out_specs=pl.BlockSpec((tm, dout), lambda i: (i, 0)),
        compiler_params=pltpu.CompilerParams(
            dimension_semantics=("parallel",), vmem_limit_bytes=vmem),
    )(x2, w, b.reshape(1, dout))
    return out.reshape(lead + (dout,))


# ------------------------------------------------------------------ stacked transformer blocks

def _stacked_block_kernel(x_ref, n1g_ref, n1b_ref,
                          wq_ref, wk_ref, wv_ref, bq_ref, bk_ref, bv_ref,
                          wo_ref, bo_ref,
                          n2g_ref, n2b_ref,
                          w1_ref, b1_ref, w2_ref, b2_ref,
                          o_ref, *, num_heads, eps):
    """All `depth` pre-norm ViT blocks for one batch element.

    grid = (batch, layer). The residual stream lives in the output block, which stays
    VMEM-resident across the whole layer axis (constant output block index); per-layer
    weights are streamed in by index_map so the next layer's DMAs overlap this layer's compute.
    """
    @pl.when(pl.program_id(1) == 0)
    def _():                                              # load residual stream at layer 0
        o_ref[...] = x_ref[...]

    x = o_ref[0].astype(jnp.float32)                      # (N, D) residual stream, f32 in VMEM

    # ---- attention branch: full-width lane-dense GEMMs (scale pre-folded into Wq / bq)
    h = _layernorm_f32(x, n1g_ref[0], n1b_ref[0], eps).astype(jnp.bfloat16)
    q = (jnp.dot(h, wq_ref[0], preferred_element_type=jnp.float32)
         + bq_ref[0]).astype(jnp.bfloat16)                # (N, D)
    k = (jnp.dot(h, wk_ref[0], preferred_element_type=jnp.float32)
         + bk_ref[0]).astype(jnp.bfloat16)
    v = (jnp.dot(h, wv_ref[0], preferred_element_type=jnp.float32)
         + bv_ref[0]).astype(jnp.bfloat16)

    d = x.shape[-1]
    dh = d // num_heads
    heads = []
    # TODO(synk): for production head counts / sequence lengths, replace this static unroll
    #             with a token-tiled (flash-style) lax.fori_loop to bound live ranges & VMEM.
    for hd in range(num_heads):
        lo = hd * dh
        s = jax.lax.dot_general(q[:, lo:lo + dh], k[:, lo:lo + dh],
                                dimension_numbers=(((1,), (1,)), ((), ())),
                                preferred_element_type=jnp.float32)          # (N, N)
        s = s - jnp.max(s, axis=-1, keepdims=True)
        p = jnp.exp(s)
        p = p * pl.reciprocal(jnp.sum(p, axis=-1, keepdims=True), approx=True)
        heads.append(jnp.dot(p.astype(jnp.bfloat16), v[:, lo:lo + dh],
                             preferred_element_type=jnp.float32))            # (N, dh)
    attn = jnp.concatenate(heads, axis=-1).astype(jnp.bfloat16)              # (N, D)
    x = x + jnp.dot(attn, wo_ref[0], preferred_element_type=jnp.float32) + bo_ref[0]

    # ---- MLP branch
    h = _layernorm_f32(x, n2g_ref[0], n2b_ref[0], eps)
    h = jnp.dot(h.astype(jnp.bfloat16), w1_ref[0],
                preferred_element_type=jnp.float32) + b1_ref[0]
    # TODO(synk): torch nn.GELU is exact (erf); tanh approximation used for the TPU EUP path.
    h = jax.nn.gelu(h, approximate=True)
    h = jnp.dot(h.astype(jnp.bfloat16), w2_ref[0],
                preferred_element_type=jnp.float32) + b2_ref[0]
    o_ref[0] = (x + h).astype(o_ref.dtype)                # second residual, still in VMEM


def blocks_forward(x, p, num_heads, eps=1e-5):
    b, n, d = x.shape
    depth, _, hidden = p["blk_w1"].shape

    act = lambda i, l: (i, 0, 0)       # activation / residual stream: constant over layer axis
    lyr = lambda i, l: (l, 0, 0)       # per-layer weights: walk the stacked layer axis

    def wspec(*shape):
        return pl.BlockSpec((1,) + shape, lyr)

    vmem = _vmem_limit(
        [((1, n, d), x.dtype)] * 2
        + [((d, d), jnp.bfloat16)] * 4
        + [((d, hidden), jnp.bfloat16), ((hidden, d), jnp.bfloat16)]
        + [((1, d), jnp.float32)] * 9 + [((1, hidden), jnp.float32)])

    return pl.pallas_call(
        functools.partial(_stacked_block_kernel, num_heads=num_heads, eps=eps),
        out_shape=jax.ShapeDtypeStruct((b, n, d), x.dtype),
        grid=(b, depth),
        in_specs=[
            pl.BlockSpec((1, n, d), act),               # x (read once per batch, layer 0)
            wspec(1, d), wspec(1, d),                   # norm1 gamma / beta
            wspec(d, d), wspec(d, d), wspec(d, d),      # wq / wk / wv (lane-dense)
            wspec(1, d), wspec(1, d), wspec(1, d),      # bq / bk / bv
            wspec(d, d), wspec(1, d),                   # out-proj weight / bias
            wspec(1, d), wspec(1, d),                   # norm2 gamma / beta
            wspec(d, hidden), wspec(1, hidden),         # fc1 weight / bias
            wspec(hidden, d), wspec(1, d),              # fc2 weight / bias
        ],
        out_specs=pl.BlockSpec((1, n, d), act),         # residual stream, VMEM-resident over l
        compiler_params=pltpu.CompilerParams(
            dimension_semantics=("parallel", "arbitrary"),
            vmem_limit_bytes=vmem),
    )(x,
      p["blk_n1_g"], p["blk_n1_b"],
      p["blk_wq"], p["blk_wk"], p["blk_wv"],
      p["blk_bq"], p["blk_bk"], p["blk_bv"],
      p["blk_wo"], p["blk_bo"],
      p["blk_n2_g"], p["blk_n2_b"],
      p["blk_w1"], p["blk_b1"], p["blk_w2"], p["blk_b2"])


# ------------------------------------------------------------------ mask head

def _mask_head_kernel(x_ref, dng_ref, dnb_ref, wp_ref, wc_ref, mng_ref, mnb_ref, o_ref,
                      *, n_patches, eps):
    x = x_ref[0].astype(jnp.float32)                           # (N + n_cls, D)
    xn = _layernorm_f32(x, dng_ref[...], dnb_ref[...], eps)    # fused decoder_norm
    xb = xn.astype(jnp.bfloat16)
    p = jnp.dot(xb[:n_patches, :], wp_ref[...], preferred_element_type=jnp.float32)   # (N, D)
    c = jnp.dot(xb[n_patches:, :], wc_ref[...], preferred_element_type=jnp.float32)   # (n_cls, D)
    # L2 normalize (x / x.norm(dim=-1)); tiny floor avoids Inf on an all-zero row.
    p = p * jax.lax.rsqrt(jnp.maximum(jnp.sum(p * p, axis=-1, keepdims=True), 1e-24))
    c = c * jax.lax.rsqrt(jnp.maximum(jnp.sum(c * c, axis=-1, keepdims=True), 1e-24))
    # Lane-dense layout: masks^T = classes @ patches^T -> (n_cls, N); bf16 inputs, f32 acc.
    m = jax.lax.dot_general(c.astype(jnp.bfloat16), p.astype(jnp.bfloat16),
                            dimension_numbers=(((1,), (1,)), ((), ())),
                            preferred_element_type=jnp.float32)
    # mask_norm == LayerNorm over n_cls -> reduce over the sublane axis in this layout.
    mean = jnp.mean(m, axis=0, keepdims=True)
    var = jnp.mean((m - mean) ** 2, axis=0, keepdims=True)
    y = (m - mean) * jax.lax.rsqrt(var + eps)
    o_ref[0] = (y * mng_ref[...] + mnb_ref[...]).astype(o_ref.dtype)


def mask_head_pallas(x, params, n_patches, n_cls, eps=1e-5):
    b, n_tot, d = x.shape
    c2 = lambda i: (0, 0)
    vmem = _vmem_limit([((1, n_tot, d), x.dtype),
                        ((d, d), jnp.bfloat16), ((d, d), jnp.bfloat16),
                        ((1, d), jnp.float32), ((1, d), jnp.float32),
                        ((n_cls, 1), jnp.float32), ((n_cls, 1), jnp.float32),
                        ((1, n_cls, n_patches), x.dtype)])
    return pl.pallas_call(
        functools.partial(_mask_head_kernel, n_patches=n_patches, eps=eps),
        out_shape=jax.ShapeDtypeStruct((b, n_cls, n_patches), x.dtype),
        grid=(b,),
        in_specs=[
            pl.BlockSpec((1, n_tot, d), lambda i: (i, 0, 0)),
            _const_spec((1, d), c2), _const_spec((1, d), c2),   # decoder_norm gamma / beta
            _const_spec((d, d), c2),                            # proj_patch   (bf16)
            _const_spec((d, d), c2),                            # proj_classes (bf16)
            _const_spec((n_cls, 1), c2),                        # mask_norm gamma
            _const_spec((n_cls, 1), c2),                        # mask_norm beta
        ],
        out_specs=pl.BlockSpec((1, n_cls, n_patches), lambda i: (i, 0, 0)),
        compiler_params=pltpu.CompilerParams(
            dimension_semantics=("parallel",), vmem_limit_bytes=vmem),
    )(x,
      params["dec_norm_g"].reshape(1, d), params["dec_norm_b"].reshape(1, d),
      params["proj_patch"], params["proj_classes"],
      params["mask_norm_g"].reshape(n_cls, 1), params["mask_norm_b"].reshape(n_cls, 1))


# ------------------------------------------------------------------ model glue

def mask_transformer_forward(x, params, im_size, patch_size, n_cls, num_heads):
    H, W = im_size
    gs_h, gs_w = H // patch_size, W // patch_size
    b, n_patches, _ = x.shape
    x = linear_pallas(x, params["proj_dec_w"], params["proj_dec_b"])
    d_model = x.shape[-1]
    cls_emb = jnp.broadcast_to(params["cls_emb"].astype(x.dtype), (b, n_cls, d_model))
    x = jnp.concatenate([x, cls_emb], axis=1)
    x = blocks_forward(x, params, num_heads)                       # all blocks in ONE kernel
    masks_t = mask_head_pallas(x, params, n_patches, n_cls)        # (B, n_cls, N) lane-dense
    # 'b (h w) n -> b n h w': kernel already produced class-major output -> pure reshape.
    return masks_t.reshape(b, n_cls, gs_h, gs_w)


# ------------------------------------------------------------------ params

def init_params(key, d_enc, d_model, depth, mlp_ratio, n_cls, num_heads):
    hidden = int(d_model * mlp_ratio)
    dh = d_model // num_heads
    head_scale = dh ** -0.5
    proj_scale = d_model ** -0.5
    keys = jax.random.split(key, 4 + depth)

    def trunc(k, shape):
        return 0.02 * jax.random.truncated_normal(k, -2.0, 2.0, shape, jnp.float32)

    params = {
        "proj_dec_w": trunc(keys[0], (d_enc, d_model)).astype(jnp.bfloat16),
        "proj_dec_b": jnp.zeros((d_model,), jnp.float32),
        "cls_emb": trunc(keys[1], (1, n_cls, d_model)),
        "proj_patch": (proj_scale * jax.random.normal(keys[2], (d_model, d_model),
                                                      jnp.float32)).astype(jnp.bfloat16),
        "proj_classes": (proj_scale * jax.random.normal(keys[3], (d_model, d_model),
                                                        jnp.float32)).astype(jnp.bfloat16),
        "dec_norm_g": jnp.ones((d_model,), jnp.float32),
        "dec_norm_b": jnp.zeros((d_model,), jnp.float32),
        "mask_norm_g": jnp.ones((n_cls,), jnp.float32),
        "mask_norm_b": jnp.zeros((n_cls,), jnp.float32),
    }

    layer = {name: [] for name in
             ("n1_g", "n1_b", "wq", "wk", "wv", "bq", "bk", "bv", "wo", "bo",
              "n2_g", "n2_b", "w1", "b1", "w2", "b2")}
    for i in range(depth):
        lk = jax.random.split(keys[4 + i], 4)
        # nn.Linear(D, 3D): output columns ordered [q | k | v] (timm) -> split once here.
        # Weights stay LANE-DENSE (D, D); NOTE: verify column ordering when importing
        # pretrained PyTorch weights.
        wqkv = trunc(lk[0], (d_model, 3 * d_model))
        layer["n1_g"].append(jnp.ones((1, d_model), jnp.float32))
        layer["n1_b"].append(jnp.zeros((1, d_model), jnp.float32))
        # attention scale dh^-0.5 folded into Wq / bq (free; removes (N,N) VALU multiply).
        layer["wq"].append((wqkv[:, :d_model] * head_scale).astype(jnp.bfloat16))
        layer["wk"].append(wqkv[:, d_model:2 * d_model].astype(jnp.bfloat16))
        layer["wv"].append(wqkv[:, 2 * d_model:].astype(jnp.bfloat16))
        layer["bq"].append(jnp.zeros((1, d_model), jnp.float32))   # zero bias * scale == zero
        layer["bk"].append(jnp.zeros((1, d_model), jnp.float32))
        layer["bv"].append(jnp.zeros((1, d_model), jnp.float32))
        layer["wo"].append(trunc(lk[1], (d_model, d_model)).astype(jnp.bfloat16))
        layer["bo"].append(jnp.zeros((1, d_model), jnp.float32))
        layer["n2_g"].append(jnp.ones((1, d_model), jnp.float32))
        layer["n2_b"].append(jnp.zeros((1, d_model), jnp.float32))
        layer["w1"].append(trunc(lk[2], (d_model, hidden)).astype(jnp.bfloat16))
        layer["b1"].append(jnp.zeros((1, hidden), jnp.float32))
        layer["w2"].append(trunc(lk[3], (hidden, d_model)).astype(jnp.bfloat16))
        layer["b2"].append(jnp.zeros((1, d_model), jnp.float32))

    for name, vals in layer.items():
        params["blk_" + name] = jnp.stack(vals, axis=0)   # leading layer axis for the stacked kernel
    return params


# ------------------------------------------------------------------ main

if __name__ == "__main__":
    patch_size = 4
    im_size = (16, 16)                     # -> GS = 4, N = 16 patch tokens
    encoder_embed_dim = 32
    decoder_embed_dim = 32
    decoder_depth = 2
    decoder_num_heads = 4
    mlp_ratio = 4.0
    n_cls = 8
    batch = 2

    # Feature-probe Buffered(1) support for constant-index weight blocks (falls back cleanly).
    _SINGLE_BUFFER_WEIGHTS = _probe_single_buffering()

    n_tokens = (im_size[0] // patch_size) * (im_size[1] // patch_size)

    key = jax.random.PRNGKey(0)
    kx, kp = jax.random.split(key)
    x = jax.random.normal(kx, (batch, n_tokens, encoder_embed_dim), jnp.float32)
    params = init_params(kp, encoder_embed_dim, decoder_embed_dim,
                         decoder_depth, mlp_ratio, n_cls, decoder_num_heads)

    fwd = jax.jit(functools.partial(mask_transformer_forward,
                                    im_size=im_size, patch_size=patch_size,
                                    n_cls=n_cls, num_heads=decoder_num_heads))
    masks = jax.block_until_ready(fwd(x, params))

    expected = (batch, n_cls, im_size[0] // patch_size, im_size[1] // patch_size)
    assert masks.shape == expected, (masks.shape, expected)
    assert bool(jnp.all(jnp.isfinite(masks)))
    print("KERNEL_OK")
</pallas_src>

<mosaic_0001>
module attributes {stable_mosaic.version = 11 : i64} {
  func.func @k(%arg0: i32, %arg1: memref<8x128xf32, #tpu.memory_space<vmem>>, %arg2: memref<8x128xf32, #tpu.memory_space<vmem>>) attributes {dimension_semantics = [#tpu.dimension_semantics<arbitrary>], iteration_bounds = array<i64: 2>, scalar_prefetch = 0 : i64, scratch_operands = 0 : i64, tpu.core_type = #tpu.core_type<tc>, window_params = [{pipeline_mode = #tpu.pipeline_mode<synchronous>, transform_indices = @transform_0, window_bounds = array<i64: 8, 128>}, {transform_indices = @transform_1, window_bounds = array<i64: 8, 128>}]} {
    %c0 = arith.constant 0 : index
    %c0_0 = arith.constant 0 : index
    %0 = vector.load %arg1[%c0, %c0_0] : memref<8x128xf32, #tpu.memory_space<vmem>>, vector<8x128xf32>
    %cst = arith.constant 1.000000e+00 : f32
    %1 = vector.broadcast %cst : f32 to vector<8x128xf32>
    %2 = arith.addf %0, %1 : vector<8x128xf32>
    %c0_1 = arith.constant 0 : index
    %c0_2 = arith.constant 0 : index
    %3 = vector.load %arg2[%c0_1, %c0_2] : memref<8x128xf32, #tpu.memory_space<vmem>>, vector<8x128xf32>
    tpu.vector_store %arg2[%c0_1, %c0_2], %2 {strides = array<i32>} : memref<8x128xf32, #tpu.memory_space<vmem>>, vector<8x128xf32>,
    return
  }
  func.func @transform_0(%arg0: i32) -> (i32, i32) {
    %c0_i32 = arith.constant 0 : i32
    %c0_i32_0 = arith.constant 0 : i32
    %c0_i32_1 = arith.constant 0 : i32
    return %c0_i32, %c0_i32_0 : i32, i32
  }
  func.func @transform_1(%arg0: i32) -> (i32, i32) {
    %c0_i32 = arith.constant 0 : i32
    %c0_i32_0 = arith.constant 0 : i32
    return %arg0, %c0_i32 : i32, i32
  }
}

module attributes {stable_mosaic.version = 11 : i64} {
  func.func @_linear_kernel(%arg0: i32, %arg1: memref<32x32xf32, #tpu.memory_space<vmem>>, %arg2: memref<32x32xbf16, #tpu.memory_space<vmem>>, %arg3: memref<1x32xf32, #tpu.memory_space<vmem>>, %arg4: memref<32x32xf32, #tpu.memory_space<vmem>>) attributes {dimension_semantics = [#tpu.dimension_semantics<parallel>], iteration_bounds = array<i64: 1>, scalar_prefetch = 0 : i64, scratch_operands = 0 : i64, tpu.core_type = #tpu.core_type<tc>, window_params = [{transform_indices = @transform_0, window_bounds = array<i64: 32, 32>}, {pipeline_mode = #tpu.pipeline_mode<synchronous>, transform_indices = @transform_1, window_bounds = array<i64: 32, 32>}, {pipeline_mode = #tpu.pipeline_mode<synchronous>, transform_indices = @transform_2, window_bounds = array<i64: 1, 32>}, {transform_indices = @transform_3, window_bounds = array<i64: 32, 32>}]} {
    %c0 = arith.constant 0 : index
    %c0_0 = arith.constant 0 : index
    %0 = vector.load %arg1[%c0, %c0_0] : memref<32x32xf32, #tpu.memory_space<vmem>>, vector<32x32xf32>
    %1 = arith.truncf %0 : vector<32x32xf32> to vector<32x32xbf16>
    %c0_1 = arith.constant 0 : index
    %c0_2 = arith.constant 0 : index
    %2 = vector.load %arg2[%c0_1, %c0_2] : memref<32x32xbf16, #tpu.memory_space<vmem>>, vector<32x32xbf16>
    %cst = arith.constant dense<0.000000e+00> : vector<32x32xf32>
    %3 = tpu.matmul %1, %2, %cst {dimension_numbers = #tpu.dot_dimension_numbers<[1], [0], [0], [1], [0, 0, 1, 1], [], []>} : vector<32x32xbf16>, vector<32x32xbf16>, vector<32x32xf32> -> vector<32x32xf32>
    %c0_3 = arith.constant 0 : index
    %c0_4 = arith.constant 0 : index
    %4 = vector.load %arg3[%c0_3, %c0_4] : memref<1x32xf32, #tpu.memory_space<vmem>>, vector<1x32xf32>
    %5 = vector.broadcast %4 : vector<1x32xf32> to vector<32x32xf32>
    %6 = arith.addf %3, %5 : vector<32x32xf32>
    %c0_5 = arith.constant 0 : index
    %c0_6 = arith.constant 0 : index
    %7 = vector.load %arg4[%c0_5, %c0_6] : memref<32x32xf32, #tpu.memory_space<vmem>>, vector<32x32xf32>
    tpu.vector_store %arg4[%c0_5, %c0_6], %6 {strides = array<i32>} : memref<32x32xf32, #tpu.memory_space<vmem>>, vector<32x32xf32>,
    return
  }
  func.func @transform_0(%arg0: i32) -> (i32, i32) {
    %c0_i32 = arith.constant 0 : i32
    %c0_i32_0 = arith.constant 0 : i32
    return %arg0, %c0_i32 : i32, i32
  }
  func.func @transform_1(%arg0: i32) -> (i32, i32) {
    %c0_i32 = arith.constant 0 : i32
    %c0_i32_0 = arith.constant 0 : i32
    %c0_i32_1 = arith.constant 0 : i32
    return %c0_i32, %c0_i32_0 : i32, i32
  }
  func.func @transform_2(%arg0: i32) -> (i32, i32) {
    %c0_i32 = arith.constant 0 : i32
    %c0_i32_0 = arith.constant 0 : i32
    %c0_i32_1 = arith.constant 0 : i32
    return %c0_i32, %c0_i32_0 : i32, i32
  }
  func.func @transform_3(%arg0: i32) -> (i32, i32) {
    %c0_i32 = arith.constant 0 : i32
    %c0_i32_0 = arith.constant 0 : i32
    return %arg0, %c0_i32 : i32, i32
  }
}

module attributes {stable_mosaic.version = 11 : i64} {
  func.func @_stacked_block_kernel(%arg0: i32, %arg1: i32, %arg2: memref<1x24x32xf32, #tpu.memory_space<vmem>>, %arg3: memref<1x1x32xf32, #tpu.memory_space<vmem>>, %arg4: memref<1x1x32xf32, #tpu.memory_space<vmem>>, %arg5: memref<1x32x32xbf16, #tpu.memory_space<vmem>>, %arg6: memref<1x32x32xbf16, #tpu.memory_space<vmem>>, %arg7: memref<1x32x32xbf16, #tpu.memory_space<vmem>>, %arg8: memref<1x1x32xf32, #tpu.memory_space<vmem>>, %arg9: memref<1x1x32xf32, #tpu.memory_space<vmem>>, %arg10: memref<1x1x32xf32, #tpu.memory_space<vmem>>, %arg11: memref<1x32x32xbf16, #tpu.memory_space<vmem>>, %arg12: memref<1x1x32xf32, #tpu.memory_space<vmem>>, %arg13: memref<1x1x32xf32, #tpu.memory_space<vmem>>, %arg14: memref<1x1x32xf32, #tpu.memory_space<vmem>>, %arg15: memref<1x32x128xbf16, #tpu.memory_space<vmem>>, %arg16: memref<1x1x128xf32, #tpu.memory_space<vmem>>, %arg17: memref<1x128x32xbf16, #tpu.memory_space<vmem>>, %arg18: memref<1x1x32xf32, #tpu.memory_space<vmem>>, %arg19: memref<1x24x32xf32, #tpu.memory_space<vmem>>) attributes {dimension_semantics = [#tpu.dimension_semantics<parallel>, #tpu.dimension_semantics<arbitrary>], iteration_bounds = array<i64: 2, 2>, scalar_prefetch = 0 : i64, scratch_operands = 0 : i64, tpu.core_type = #tpu.core_type<tc>, window_params = [{transform_indices = @transform_0, window_bounds = array<i64: 1, 24, 32>}, {transform_indices = @transform_1, window_bounds = array<i64: 1, 1, 32>}, {transform_indices = @transform_2, window_bounds = array<i64: 1, 1, 32>}, {transform_indices = @transform_3, window_bounds = array<i64: 1, 32, 32>}, {transform_indices = @transform_4, window_bounds = array<i64: 1, 32, 32>}, {transform_indices = @transform_5, window_bounds = array<i64: 1, 32, 32>}, {transform_indices = @transform_6, window_bounds = array<i64: 1, 1, 32>}, {transform_indices = @transform_7, window_bounds = array<i64: 1, 1, 32>}, {transform_indices = @transform_8, window_bounds = array<i64: 1, 1, 32>}, {transform_indices = @transform_9, window_bounds = array<i64: 1, 32, 32>}, {transform_indices = @transform_10, window_bounds = array<i64: 1, 1, 32>}, {transform_indices = @transform_11, window_bounds = array<i64: 1, 1, 32>}, {transform_indices = @transform_12, window_bounds = array<i64: 1, 1, 32>}, {transform_indices = @transform_13, window_bounds = array<i64: 1, 32, 128>}, {transform_indices = @transform_14, window_bounds = array<i64: 1, 1, 128>}, {transform_indices = @transform_15, window_bounds = array<i64: 1, 128, 32>}, {transform_indices = @transform_16, window_bounds = array<i64: 1, 1, 32>}, {transform_indices = @transform_17, window_bounds = array<i64: 1, 24, 32>}]} {
    %c0_i32 = arith.constant 0 : i32
    %0 = arith.cmpi eq, %arg1, %c0_i32 : i32
    %1 = arith.extui %0 : i1 to i32
    %c0_i32_0 = arith.constant 0 : i32
    %2 = arith.cmpi ne, %1, %c0_i32_0 : i32
    scf.if %2 {
      %c0_89 = arith.constant 0 : index
      %c0_90 = arith.constant 0 : index
      %c0_91 = arith.constant 0 : index
      %189 = vector.load %arg2[%c0_89, %c0_90, %c0_91] : memref<1x24x32xf32, #tpu.memory_space<vmem>>, vector<1x24x32xf32>
      %c0_92 = arith.constant 0 : index
      %c0_93 = arith.constant 0 : index
      %c0_94 = arith.constant 0 : index
      %190 = vector.load %arg19[%c0_92, %c0_93, %c0_94] : memref<1x24x32xf32, #tpu.memory_space<vmem>>, vector<1x24x32xf32>
      tpu.vector_store %arg19[%c0_92, %c0_93, %c0_94], %189 {strides = array<i32>} : memref<1x24x32xf32, #tpu.memory_space<vmem>>, vector<1x24x32xf32>,
    } else {
    }
    %c0 = arith.constant 0 : index
    %c0_1 = arith.constant 0 : index
    %c0_2 = arith.constant 0 : index
    %3 = vector.load %arg19[%c0, %c0_1, %c0_2] : memref<1x24x32xf32, #tpu.memory_space<vmem>>, vector<1x24x32xf32>
    %4 = vector.shape_cast %3 : vector<1x24x32xf32> to vector<24x32xf32>
    %c0_3 = arith.constant 0 : index
    %c0_4 = arith.constant 0 : index
    %c0_5 = arith.constant 0 : index
    %5 = vector.load %arg3[%c0_3, %c0_4, %c0_5] : memref<1x1x32xf32, #tpu.memory_space<vmem>>, vector<1x1x32xf32>
    %6 = vector.shape_cast %5 : vector<1x1x32xf32> to vector<1x32xf32>
    %c0_6 = arith.constant 0 : index
    %c0_7 = arith.constant 0 : index
    %c0_8 = arith.constant 0 : index
    %7 = vector.load %arg4[%c0_6, %c0_7, %c0_8] : memref<1x1x32xf32, #tpu.memory_space<vmem>>, vector<1x1x32xf32>
    %8 = vector.shape_cast %7 : vector<1x1x32xf32> to vector<1x32xf32>
    %cst = arith.constant dense<0.000000e+00> : vector<24xf32>
    %9 = vector.multi_reduction <add>, %4, %cst [1] : vector<24x32xf32> to vector<24xf32>
    %10 = vector.shape_cast %9 : vector<24xf32> to vector<24x1xf32>
    %cst_9 = arith.constant 3.200000e+01 : f32
    %11 = vector.broadcast %cst_9 : f32 to vector<24x1xf32>
    %12 = arith.divf %10, %11 : vector<24x1xf32>
    %13 = vector.broadcast %12 : vector<24x1xf32> to vector<24x32xf32>
    %14 = arith.subf %4, %13 : vector<24x32xf32>
    %15 = arith.mulf %14, %14 : vector<24x32xf32>
    %cst_10 = arith.constant dense<0.000000e+00> : vector<24xf32>
    %16 = vector.multi_reduction <add>, %15, %cst_10 [1] : vector<24x32xf32> to vector<24xf32>
    %17 = vector.shape_cast %16 : vector<24xf32> to vector<24x1xf32>
    %cst_11 = arith.constant 3.200000e+01 : f32
    %18 = vector.broadcast %cst_11 : f32 to vector<24x1xf32>
    %19 = arith.divf %17, %18 : vector<24x1xf32>
    %20 = vector.broadcast %12 : vector<24x1xf32> to vector<24x32xf32>
    %21 = arith.subf %4, %20 : vector<24x32xf32>
    %cst_12 = arith.constant 9.99999974E-6 : f32
    %22 = vector.broadcast %cst_12 : f32 to vector<24x1xf32>
    %23 = arith.addf %19, %22 : vector<24x1xf32>
    %24 = math.rsqrt %23 : vector<24x1xf32>
    %25 = vector.broadcast %24 : vector<24x1xf32> to vector<24x32xf32>
    %26 = arith.mulf %21, %25 : vector<24x32xf32>
    %27 = vector.broadcast %6 : vector<1x32xf32> to vector<24x32xf32>
    %28 = arith.mulf %26, %27 : vector<24x32xf32>
    %29 = vector.broadcast %8 : vector<1x32xf32> to vector<24x32xf32>
    %30 = arith.addf %28, %29 : vector<24x32xf32>
    %31 = arith.truncf %30 : vector<24x32xf32> to vector<24x32xbf16>
    %c0_13 = arith.constant 0 : index
    %c0_14 = arith.constant 0 : index
    %c0_15 = arith.constant 0 : index
    %32 = vector.load %arg5[%c0_13, %c0_14, %c0_15] : memref<1x32x32xbf16, #tpu.memory_space<vmem>>, vector<1x32x32xbf16>
    %33 = vector.shape_cast %32 : vector<1x32x32xbf16> to vector<32x32xbf16>
    %cst_16 = arith.constant dense<0.000000e+00> : vector<24x32xf32>
    %34 = tpu.matmul %31, %33, %cst_16 {dimension_numbers = #tpu.dot_dimension_numbers<[1], [0], [0], [1], [0, 0, 1, 1], [], []>} : vector<24x32xbf16>, vector<32x32xbf16>, vector<24x32xf32> -> vector<24x32xf32>
    %c0_17 = arith.constant 0 : index
    %c0_18 = arith.constant 0 : index
    %c0_19 = arith.constant 0 : index
    %35 = vector.load %arg8[%c0_17, %c0_18, %c0_19] : memref<1x1x32xf32, #tpu.memory_space<vmem>>, vector<1x1x32xf32>
    %36 = vector.shape_cast %35 : vector<1x1x32xf32> to vector<1x32xf32>
    %37 = vector.broadcast %36 : vector<1x32xf32> to vector<24x32xf32>
    %38 = arith.addf %34, %37 : vector<24x32xf32>
    %39 = arith.truncf %38 : vector<24x32xf32> to vector<24x32xbf16>
    %c0_20 = arith.constant 0 : index
    %c0_21 = arith.constant 0 : index
    %c0_22 = arith.constant 0 : index
    %40 = vector.load %arg6[%c0_20, %c0_21, %c0_22] : memref<1x32x32xbf16, #tpu.memory_space<vmem>>, vector<1x32x32xbf16>
    %41 = vector.shape_cast %40 : vector<1x32x32xbf16> to vector<32x32xbf16>
    %cst_23 = arith.constant dense<0.000000e+00> : vector<24x32xf32>
    %42 = tpu.matmul %31, %41, %cst_23 {dimension_numbers = #tpu.dot_dimension_numbers<[1], [0], [0], [1], [0, 0, 1, 1], [], []>} : vector<24x32xbf16>, vector<32x32xbf16>, vector<24x32xf32> -> vector<24x32xf32>
    %c0_24 = arith.constant 0 : index
    %c0_25 = arith.constant 0 : index
    %c0_26 = arith.constant 0 : index
    %43 = vector.load %arg9[%c0_24, %c0_25, %c0_26] : memref<1x1x32xf32, #tpu.memory_space<vmem>>, vector<1x1x32xf32>
    %44 = vector.shape_cast %43 : vector<1x1x32xf32> to vector<1x32xf32>
    %45 = vector.broadcast %44 : vector<1x32xf32> to vector<24x32xf32>
    %46 = arith.addf %42, %45 : vector<24x32xf32>
    %47 = arith.truncf %46 : vector<24x32xf32> to vector<24x32xbf16>
    %c0_27 = arith.constant 0 : index
    %c0_28 = arith.constant 0 : index
    %c0_29 = arith.constant 0 : index
    %48 = vector.load %arg7[%c0_27, %c0_28, %c0_29] : memref<1x32x32xbf16, #tpu.memory_space<vmem>>, vector<1x32x32xbf16>
    %49 = vector.shape_cast %48 : vector<1x32x32xbf16> to vector<32x32xbf16>
    %cst_30 = arith.constant dense<0.000000e+00> : vector<24x32xf32>
    %50 = tpu.matmul %31, %49, %cst_30 {dimension_numbers = #tpu.dot_dimension_numbers<[1], [0], [0], [1], [0, 0, 1, 1], [], []>} : vector<24x32xbf16>, vector<32x32xbf16>, vector<24x32xf32> -> vector<24x32xf32>
    %c0_31 = arith.constant 0 : index
    %c0_32 = arith.constant 0 : index
    %c0_33 = arith.constant 0 : index
    %51 = vector.load %arg10[%c0_31, %c0_32, %c0_33] : memref<1x1x32xf32, #tpu.memory_space<vmem>>, vector<1x1x32xf32>
    %52 = vector.shape_cast %51 : vector<1x1x32xf32> to vector<1x32xf32>
    %53 = vector.broadcast %52 : vector<1x32xf32> to vector<24x32xf32>
    %54 = arith.addf %50, %53 : vector<24x32xf32>
    %55 = arith.truncf %54 : vector<24x32xf32> to vector<24x32xbf16>
    %56 = vector.extract_strided_slice %39 {offsets = [0, 0], sizes = [24, 8], strides = [1, 1]} : vector<24x32xbf16> to vector<24x8xbf16>
    %57 = vector.extract_strided_slice %47 {offsets = [0, 0], sizes = [24, 8], strides = [1, 1]} : vector<24x32xbf16> to vector<24x8xbf16>
    %cst_34 = arith.constant dense<0.000000e+00> : vector<24x24xf32>
    %58 = tpu.matmul %56, %57, %cst_34 {dimension_numbers = #tpu.dot_dimension_numbers<[1], [1], [0], [0], [0, 0, 1, 0], [], []>} : vector<24x8xbf16>, vector<24x8xbf16>, vector<24x24xf32> -> vector<24x24xf32>
    %cst_35 = arith.constant dense<0xFF800000> : vector<24xf32>
    %59 = vector.multi_reduction <maximumf>, %58, %cst_35 [1] : vector<24x24xf32> to vector<24xf32>
    %60 = vector.shape_cast %59 : vector<24xf32> to vector<24x1xf32>
    %61 = vector.broadcast %60 : vector<24x1xf32> to vector<24x24xf32>
    %62 = arith.subf %58, %61 : vector<24x24xf32>
    %63 = math.exp %62 : vector<24x24xf32>
    %cst_36 = arith.constant dense<0.000000e+00> : vector<24xf32>
    %64 = vector.multi_reduction <add>, %63, %cst_36 [1] : vector<24x24xf32> to vector<24xf32>
    %65 = vector.shape_cast %64 : vector<24xf32> to vector<24x1xf32>
    %66 = tpu.reciprocal %65 {approx = true} : vector<24x1xf32> -> vector<24x1xf32>
    %67 = vector.broadcast %66 : vector<24x1xf32> to vector<24x24xf32>
    %68 = arith.mulf %63, %67 : vector<24x24xf32>
    %69 = arith.truncf %68 : vector<24x24xf32> to vector<24x24xbf16>
    %70 = vector.extract_strided_slice %55 {offsets = [0, 0], sizes = [24, 8], strides = [1, 1]} : vector<24x32xbf16> to vector<24x8xbf16>
    %cst_37 = arith.constant dense<0.000000e+00> : vector<24x8xf32>
    %71 = tpu.matmul %69, %70, %cst_37 {dimension_numbers = #tpu.dot_dimension_numbers<[1], [0], [0], [1], [0, 0, 1, 1], [], []>} : vector<24x24xbf16>, vector<24x8xbf16>, vector<24x8xf32> -> vector<24x8xf32>
    %72 = vector.extract_strided_slice %39 {offsets = [0, 8], sizes = [24, 8], strides = [1, 1]} : vector<24x32xbf16> to vector<24x8xbf16>
    %73 = vector.extract_strided_slice %47 {offsets = [0, 8], sizes = [24, 8], strides = [1, 1]} : vector<24x32xbf16> to vector<24x8xbf16>
    %cst_38 = arith.constant dense<0.000000e+00> : vector<24x24xf32>
    %74 = tpu.matmul %72, %73, %cst_38 {dimension_numbers = #tpu.dot_dimension_numbers<[1], [1], [0], [0], [0, 0, 1, 0], [], []>} : vector<24x8xbf16>, vector<24x8xbf16>, vector<24x24xf32> -> vector<24x24xf32>
    %cst_39 = arith.constant dense<0xFF800000> : vector<24xf32>
    %75 = vector.multi_reduction <maximumf>, %74, %cst_39 [1] : vector<24x24xf32> to vector<24xf32>
    %76 = vector.shape_cast %75 : vector<24xf32> to vector<24x1xf32>
    %77 = vector.broadcast %76 : vector<24x1xf32> to vector<24x24xf32>
    %78 = arith.subf %74, %77 : vector<24x24xf32>
    %79 = math.exp %78 : vector<24x24xf32>
    %cst_40 = arith.constant dense<0.000000e+00> : vector<24xf32>
    %80 = vector.multi_reduction <add>, %79, %cst_40 [1] : vector<24x24xf32> to vector<24xf32>
    %81 = vector.shape_cast %80 : vector<24xf32> to vector<24x1xf32>
    %82 = tpu.reciprocal %81 {approx = true} : vector<24x1xf32> -> vector<24x1xf32>
    %83 = vector.broadcast %82 : vector<24x1xf32> to vector<24x24xf32>
    %84 = arith.mulf %79, %83 : vector<24x24xf32>
    %85 = arith.truncf %84 : vector<24x24xf32> to vector<24x24xbf16>
    %86 = vector.extract_strided_slice %55 {offsets = [0, 8], sizes = [24, 8], strides = [1, 1]} : vector<24x32xbf16> to vector<24x8xbf16>
    %cst_41 = arith.constant dense<0.000000e+00> : vector<24x8xf32>
    %87 = tpu.matmul %85, %86, %cst_41 {dimension_numbers = #tpu.dot_dimension_numbers<[1], [0], [0], [1], [0, 0, 1, 1], [], []>} : vector<24x24xbf16>, vector<24x8xbf16>, vector<24x8xf32> -> vector<24x8xf32>
    %88 = vector.extract_strided_slice %39 {offsets = [0, 16], sizes = [24, 8], strides = [1, 1]} : vector<24x32xbf16> to vector<24x8xbf16>
    %89 = vector.extract_strided_slice %47 {offsets = [0, 16], sizes = [24, 8], strides = [1, 1]} : vector<24x32xbf16> to vector<24x8xbf16>
    %cst_42 = arith.constant dense<0.000000e+00> : vector<24x24xf32>
    %90 = tpu.matmul %88, %89, %cst_42 {dimension_numbers = #tpu.dot_dimension_numbers<[1], [1], [0], [0], [0, 0, 1, 0], [], []>} : vector<24x8xbf16>, vector<24x8xbf16>, vector<24x24xf32> -> vector<24x24xf32>
    %cst_43 = arith.constant dense<0xFF800000> : vector<24xf32>
    %91 = vector.multi_reduction <maximumf>, %90, %cst_43 [1] : vector<24x24xf32> to vector<24xf32>
    %92 = vector.shape_cast %91 : vector<24xf32> to vector<24x1xf32>
    %93 = vector.broadcast %92 : vector<24x1xf32> to vector<24x24xf32>
    %94 = arith.subf %90, %93 : vector<24x24xf32>
    %95 = math.exp %94 : vector<24x24xf32>
    %cst_44 = arith.constant dense<0.000000e+00> : vector<24xf32>
    %96 = vector.multi_reduction <add>, %95, %cst_44 [1] : vector<24x24xf32> to vector<24xf32>
    %97 = vector.shape_cast %96 : vector<24xf32> to vector<24x1xf32>
    %98 = tpu.reciprocal %97 {approx = true} : vector<24x1xf32> -> vector<24x1xf32>
    %99 = vector.broadcast %98 : vector<24x1xf32> to vector<24x24xf32>
    %100 = arith.mulf %95, %99 : vector<24x24xf32>
    %101 = arith.truncf %100 : vector<24x24xf32> to vector<24x24xbf16>
    %102 = vector.extract_strided_slice %55 {offsets = [0, 16], sizes = [24, 8], strides = [1, 1]} : vector<24x32xbf16> to vector<24x8xbf16>
    %cst_45 = arith.constant dense<0.000000e+00> : vector<24x8xf32>
    %103 = tpu.matmul %101, %102, %cst_45 {dimension_numbers = #tpu.dot_dimension_numbers<[1], [0], [0], [1], [0, 0, 1, 1], [], []>} : vector<24x24xbf16>, vector<24x8xbf16>, vector<24x8xf32> -> vector<24x8xf32>
    %104 = vector.extract_strided_slice %39 {offsets = [0, 24], sizes = [24, 8], strides = [1, 1]} : vector<24x32xbf16> to vector<24x8xbf16>
    %105 = vector.extract_strided_slice %47 {offsets = [0, 24], sizes = [24, 8], strides = [1, 1]} : vector<24x32xbf16> to vector<24x8xbf16>
    %cst_46 = arith.constant dense<0.000000e+00> : vector<24x24xf32>
    %106 = tpu.matmul %104, %105, %cst_46 {dimension_numbers = #tpu.dot_dimension_numbers<[1], [1], [0], [0], [0, 0, 1, 0], [], []>} : vector<24x8xbf16>, vector<24x8xbf16>, vector<24x24xf32> -> vector<24x24xf32>
    %cst_47 = arith.constant dense<0xFF800000> : vector<24xf32>
    %107 = vector.multi_reduction <maximumf>, %106, %cst_47 [1] : vector<24x24xf32> to vector<24xf32>
    %108 = vector.shape_cast %107 : vector<24xf32> to vector<24x1xf32>
    %109 = vector.broadcast %108 : vector<24x1xf32> to vector<24x24xf32>
    %110 = arith.subf %106, %109 : vector<24x24xf32>
    %111 = math.exp %110 : vector<24x24xf32>
    %cst_48 = arith.constant dense<0.000000e+00> : vector<24xf32>
    %112 = vector.multi_reduction <add>, %111, %cst_48 [1] : vector<24x24xf32> to vector<24xf32>
    %113 = vector.shape_cast %112 : vector<24xf32> to vector<24x1xf32>
    %114 = tpu.reciprocal %113 {approx = true} : vector<24x1xf32> -> vector<24x1xf32>
    %115 = vector.broadcast %114 : vector<24x1xf32> to vector<24x24xf32>
    %116 = arith.mulf %111, %115 : vector<24x24xf32>
    %117 = arith.truncf %116 : vector<24x24xf32> to vector<24x24xbf16>
    %118 = vector.extract_strided_slice %55 {offsets = [0, 24], sizes = [24, 8], strides = [1, 1]} : vector<24x32xbf16> to vector<24x8xbf16>
    %cst_49 = arith.constant dense<0.000000e+00> : vector<24x8xf32>
    %119 = tpu.matmul %117, %118, %cst_49 {dimension_numbers = #tpu.dot_dimension_numbers<[1], [0], [0], [1], [0, 0, 1, 1], [], []>} : vector<24x24xbf16>, vector<24x8xbf16>, vector<24x8xf32> -> vector<24x8xf32>
    %120 = tpu.concatenate %71, %87, %103, %119 in 1 : vector<24x8xf32>, vector<24x8xf32>, vector<24x8xf32>, vector<24x8xf32> -> vector<24x32xf32>
    %121 = arith.truncf %120 : vector<24x32xf32> to vector<24x32xbf16>
    %c0_50 = arith.constant 0 : index
    %c0_51 = arith.constant 0 : index
    %c0_52 = arith.constant 0 : index
    %122 = vector.load %arg11[%c0_50, %c0_51, %c0_52] : memref<1x32x32xbf16, #tpu.memory_space<vmem>>, vector<1x32x32xbf16>
    %123 = vector.shape_cast %122 : vector<1x32x32xbf16> to vector<32x32xbf16>
    %cst_53 = arith.constant dense<0.000000e+00> : vector<24x32xf32>
    %124 = tpu.matmul %121, %123, %cst_53 {dimension_numbers = #tpu.dot_dimension_numbers<[1], [0], [0], [1], [0, 0, 1, 1], [], []>} : vector<24x32xbf16>, vector<32x32xbf16>, vector<24x32xf32> -> vector<24x32xf32>
    %125 = arith.addf %4, %124 : vector<24x32xf32>
    %c0_54 = arith.constant 0 : index
    %c0_55 = arith.constant 0 : index
    %c0_56 = arith.constant 0 : index
    %126 = vector.load %arg12[%c0_54, %c0_55, %c0_56] : memref<1x1x32xf32, #tpu.memory_space<vmem>>, vector<1x1x32xf32>
    %127 = vector.shape_cast %126 : vector<1x1x32xf32> to vector<1x32xf32>
    %128 = vector.broadcast %127 : vector<1x32xf32> to vector<24x32xf32>
    %129 = arith.addf %125, %128 : vector<24x32xf32>
    %c0_57 = arith.constant 0 : index
    %c0_58 = arith.constant 0 : index
    %c0_59 = arith.constant 0 : index
    %130 = vector.load %arg13[%c0_57, %c0_58, %c0_59] : memref<1x1x32xf32, #tpu.memory_space<vmem>>, vector<1x1x32xf32>
    %131 = vector.shape_cast %130 : vector<1x1x32xf32> to vector<1x32xf32>
    %c0_60 = arith.constant 0 : index
    %c0_61 = arith.constant 0 : index
    %c0_62 = arith.constant 0 : index
    %132 = vector.load %arg14[%c0_60, %c0_61, %c0_62] : memref<1x1x32xf32, #tpu.memory_space<vmem>>, vector<1x1x32xf32>
    %133 = vector.shape_cast %132 : vector<1x1x32xf32> to vector<1x32xf32>
    %cst_63 = arith.constant dense<0.000000e+00> : vector<24xf32>
    %134 = vector.multi_reduction <add>, %129, %cst_63 [1] : vector<24x32xf32> to vector<24xf32>
    %135 = vector.shape_cast %134 : vector<24xf32> to vector<24x1xf32>
    %cst_64 = arith.constant 3.200000e+01 : f32
    %136 = vector.broadcast %cst_64 : f32 to vector<24x1xf32>
    %137 = arith.divf %135, %136 : vector<24x1xf32>
    %138 = vector.broadcast %137 : vector<24x1xf32> to vector<24x32xf32>
    %139 = arith.subf %129, %138 : vector<24x32xf32>
    %140 = arith.mulf %139, %139 : vector<24x32xf32>
    %cst_65 = arith.constant dense<0.000000e+00> : vector<24xf32>
    %141 = vector.multi_reduction <add>, %140, %cst_65 [1] : vector<24x32xf32> to vector<24xf32>
    %142 = vector.shape_cast %141 : vector<24xf32> to vector<24x1xf32>
    %cst_66 = arith.constant 3.200000e+01 : f32
    %143 = vector.broadcast %cst_66 : f32 to vector<24x1xf32>
    %144 = arith.divf %142, %143 : vector<24x1xf32>
    %145 = vector.broadcast %137 : vector<24x1xf32> to vector<24x32xf32>
    %146 = arith.subf %129, %145 : vector<24x32xf32>
    %cst_67 = arith.constant 9.99999974E-6 : f32
    %147 = vector.broadcast %cst_67 : f32 to vector<24x1xf32>
    %148 = arith.addf %144, %147 : vector<24x1xf32>
    %149 = math.rsqrt %148 : vector<24x1xf32>
    %150 = vector.broadcast %149 : vector<24x1xf32> to vector<24x32xf32>
    %151 = arith.mulf %146, %150 : vector<24x32xf32>
    %152 = vector.broadcast %131 : vector<1x32xf32> to vector<24x32xf32>
    %153 = arith.mulf %151, %152 : vector<24x32xf32>
    %154 = vector.broadcast %133 : vector<1x32xf32> to vector<24x32xf32>
    %155 = arith.addf %153, %154 : vector<24x32xf32>
    %156 = arith.truncf %155 : vector<24x32xf32> to vector<24x32xbf16>
    %c0_68 = arith.constant 0 : index
    %c0_69 = arith.constant 0 : index
    %c0_70 = arith.constant 0 : index
    %157 = vector.load %arg15[%c0_68, %c0_69, %c0_70] : memref<1x32x128xbf16, #tpu.memory_space<vmem>>, vector<1x32x128xbf16>
    %158 = vector.shape_cast %157 : vector<1x32x128xbf16> to vector<32x128xbf16>
    %cst_71 = arith.constant dense<0.000000e+00> : vector<24x128xf32>
    %159 = tpu.matmul %156, %158, %cst_71 {dimension_numbers = #tpu.dot_dimension_numbers<[1], [0], [0], [1], [0, 0, 1, 1], [], []>} : vector<24x32xbf16>, vector<32x128xbf16>, vector<24x128xf32> -> vector<24x128xf32>
    %c0_72 = arith.constant 0 : index
    %c0_73 = arith.constant 0 : index
    %c0_74 = arith.constant 0 : index
    %160 = vector.load %arg16[%c0_72, %c0_73, %c0_74] : memref<1x1x128xf32, #tpu.memory_space<vmem>>, vector<1x1x128xf32>
    %161 = vector.shape_cast %160 : vector<1x1x128xf32> to vector<1x128xf32>
    %162 = vector.broadcast %161 : vector<1x128xf32> to vector<24x128xf32>
    %163 = arith.addf %159, %162 : vector<24x128xf32>
    %164 = arith.mulf %163, %163 : vector<24x128xf32>
    %165 = arith.mulf %163, %164 : vector<24x128xf32>
    %cst_75 = arith.constant 4.471500e-02 : f32
    %166 = vector.broadcast %cst_75 : f32 to vector<24x128xf32>
    %167 = arith.mulf %166, %165 : vector<24x128xf32>
    %168 = arith.addf %163, %167 : vector<24x128xf32>
    %cst_76 = arith.constant 0.797884583 : f32
    %169 = vector.broadcast %cst_76 : f32 to vector<24x128xf32>
    %170 = arith.mulf %169, %168 : vector<24x128xf32>
    %171 = math.tanh %170 : vector<24x128xf32>
    %cst_77 = arith.constant 1.000000e+00 : f32
    %172 = vector.broadcast %cst_77 : f32 to vector<24x128xf32>
    %173 = arith.addf %172, %171 : vector<24x128xf32>
    %cst_78 = arith.constant 5.000000e-01 : f32
    %174 = vector.broadcast %cst_78 : f32 to vector<24x128xf32>
    %175 = arith.mulf %174, %173 : vector<24x128xf32>
    %176 = arith.mulf %163, %175 : vector<24x128xf32>
    %177 = arith.truncf %176 : vector<24x128xf32> to vector<24x128xbf16>
    %c0_79 = arith.constant 0 : index
    %c0_80 = arith.constant 0 : index
    %c0_81 = arith.constant 0 : index
    %178 = vector.load %arg17[%c0_79, %c0_80, %c0_81] : memref<1x128x32xbf16, #tpu.memory_space<vmem>>, vector<1x128x32xbf16>
    %179 = vector.shape_cast %178 : vector<1x128x32xbf16> to vector<128x32xbf16>
    %cst_82 = arith.constant dense<0.000000e+00> : vector<24x32xf32>
    %180 = tpu.matmul %177, %179, %cst_82 {dimension_numbers = #tpu.dot_dimension_numbers<[1], [0], [0], [1], [0, 0, 1, 1], [], []>} : vector<24x128xbf16>, vector<128x32xbf16>, vector<24x32xf32> -> vector<24x32xf32>
    %c0_83 = arith.constant 0 : index
    %c0_84 = arith.constant 0 : index
    %c0_85 = arith.constant 0 : index
    %181 = vector.load %arg18[%c0_83, %c0_84, %c0_85] : memref<1x1x32xf32, #tpu.memory_space<vmem>>, vector<1x1x32xf32>
    %182 = vector.shape_cast %181 : vector<1x1x32xf32> to vector<1x32xf32>
    %183 = vector.broadcast %182 : vector<1x32xf32> to vector<24x32xf32>
    %184 = arith.addf %180, %183 : vector<24x32xf32>
    %185 = arith.addf %129, %184 : vector<24x32xf32>
    %c0_86 = arith.constant 0 : index
    %c0_87 = arith.constant 0 : index
    %c0_88 = arith.constant 0 : index
    %186 = vector.load %arg19[%c0_86, %c0_87, %c0_88] : memref<1x24x32xf32, #tpu.memory_space<vmem>>, vector<1x24x32xf32>
    %187 = vector.shape_cast %186 : vector<1x24x32xf32> to vector<24x32xf32>
    %188 = vector.shape_cast %185 : vector<24x32xf32> to vector<1x24x32xf32>
    tpu.vector_store %arg19[%c0_86, %c0_87, %c0_88], %188 {strides = array<i32>} : memref<1x24x32xf32, #tpu.memory_space<vmem>>, vector<1x24x32xf32>,
    return
  }
  func.func @transform_0(%arg0: i32, %arg1: i32) -> (i32, i32, i32) {
    %c0_i32 = arith.constant 0 : i32
    %c0_i32_0 = arith.constant 0 : i32
    %c0_i32_1 = arith.constant 0 : i32
    return %arg0, %c0_i32, %c0_i32_0 : i32, i32, i32
  }
  func.func @transform_1(%arg0: i32, %arg1: i32) -> (i32, i32, i32) {
    %c0_i32 = arith.constant 0 : i32
    %c0_i32_0 = arith.constant 0 : i32
    %c0_i32_1 = arith.constant 0 : i32
    return %arg1, %c0_i32, %c0_i32_0 : i32, i32, i32
  }
  func.func @transform_2(%arg0: i32, %arg1: i32) -> (i32, i32, i32) {
    %c0_i32 = arith.constant 0 : i32
    %c0_i32_0 = arith.constant 0 : i32
    %c0_i32_1 = arith.constant 0 : i32
    return %arg1, %c0_i32, %c0_i32_0 : i32, i32, i32
  }
  func.func @transform_3(%arg0: i32, %arg1: i32) -> (i32, i32, i32) {
    %c0_i32 = arith.constant 0 : i32
    %c0_i32_0 = arith.constant 0 : i32
    %c0_i32_1 = arith.constant 0 : i32
    return %arg1, %c0_i32, %c0_i32_0 : i32, i32, i32
  }
  func.func @transform_4(%arg0: i32, %arg1: i32) -> (i32, i32, i32) {
    %c0_i32 = arith.constant 0 : i32
    %c0_i32_0 = arith.constant 0 : i32
    %c0_i32_1 = arith.constant 0 : i32
    return %arg1, %c0_i32, %c0_i32_0 : i32, i32, i32
  }
  func.func @transform_5(%arg0: i32, %arg1: i32) -> (i32, i32, i32) {
    %c0_i32 = arith.constant 0 : i32
    %c0_i32_0 = arith.constant 0 : i32
    %c0_i32_1 = arith.constant 0 : i32
    return %arg1, %c0_i32, %c0_i32_0 : i32, i32, i32
  }
  func.func @transform_6(%arg0: i32, %arg1: i32) -> (i32, i32, i32) {
    %c0_i32 = arith.constant 0 : i32
    %c0_i32_0 = arith.constant 0 : i32
    %c0_i32_1 = arith.constant 0 : i32
    return %arg1, %c0_i32, %c0_i32_0 : i32, i32, i32
  }
  func.func @transform_7(%arg0: i32, %arg1: i32) -> (i32, i32, i32) {
    %c0_i32 = arith.constant 0 : i32
    %c0_i32_0 = arith.constant 0 : i32
    %c0_i32_1 = arith.constant 0 : i32
    return %arg1, %c0_i32, %c0_i32_0 : i32, i32, i32
  }
  func.func @transform_8(%arg0: i32, %arg1: i32) -> (i32, i32, i32) {
    %c0_i32 = arith.constant 0 : i32
    %c0_i32_0 = arith.constant 0 : i32
    %c0_i32_1 = arith.constant 0 : i32
    return %arg1, %c0_i32, %c0_i32_0 : i32, i32, i32
  }
  func.func @transform_9(%arg0: i32, %arg1: i32) -> (i32, i32, i32) {
    %c0_i32 = arith.constant 0 : i32
    %c0_i32_0 = arith.constant 0 : i32
    %c0_i32_1 = arith.constant 0 : i32
    return %arg1, %c0_i32, %c0_i32_0 : i32, i32, i32
  }
  func.func @transform_10(%arg0: i32, %arg1: i32) -> (i32, i32, i32) {
    %c0_i32 = arith.constant 0 : i32
    %c0_i32_0 = arith.constant 0 : i32
    %c0_i32_1 = arith.constant 0 : i32
    return %arg1, %c0_i32, %c0_i32_0 : i32, i32, i32
  }
  func.func @transform_11(%arg0: i32, %arg1: i32) -> (i32, i32, i32) {
    %c0_i32 = arith.constant 0 : i32
    %c0_i32_0 = arith.constant 0 : i32
    %c0_i32_1 = arith.constant 0 : i32
    return %arg1, %c0_i32, %c0_i32_0 : i32, i32, i32
  }
  func.func @transform_12(%arg0: i32, %arg1: i32) -> (i32, i32, i32) {
    %c0_i32 = arith.constant 0 : i32
    %c0_i32_0 = arith.constant 0 : i32
    %c0_i32_1 = arith.constant 0 : i32
    return %arg1, %c0_i32, %c0_i32_0 : i32, i32, i32
  }
  func.func @transform_13(%arg0: i32, %arg1: i32) -> (i32, i32, i32) {
    %c0_i32 = arith.constant 0 : i32
    %c0_i32_0 = arith.constant 0 : i32
    %c0_i32_1 = arith.constant 0 : i32
    return %arg1, %c0_i32, %c0_i32_0 : i32, i32, i32
  }
  func.func @transform_14(%arg0: i32, %arg1: i32) -> (i32, i32, i32) {
    %c0_i32 = arith.constant 0 : i32
    %c0_i32_0 = arith.constant 0 : i32
    %c0_i32_1 = arith.constant 0 : i32
    return %arg1, %c0_i32, %c0_i32_0 : i32, i32, i32
  }
  func.func @transform_15(%arg0: i32, %arg1: i32) -> (i32, i32, i32) {
    %c0_i32 = arith.constant 0 : i32
    %c0_i32_0 = arith.constant 0 : i32
    %c0_i32_1 = arith.constant 0 : i32
    return %arg1, %c0_i32, %c0_i32_0 : i32, i32, i32
  }
  func.func @transform_16(%arg0: i32, %arg1: i32) -> (i32, i32, i32) {
    %c0_i32 = arith.constant 0 : i32
    %c0_i32_0 = arith.constant 0 : i32
    %c0_i32_1 = arith.constant 0 : i32
    return %arg1, %c0_i32, %c0_i32_0 : i32, i32, i32
  }
  func.func @transform_17(%arg0: i32, %arg1: i32) -> (i32, i32, i32) {
    %c0_i32 = arith.constant 0 : i32
    %c0_i32_0 = arith.constant 0 : i32
    %c0_i32_1 = arith.constant 0 : i32
    return %arg0, %c0_i32, %c0_i32_0 : i32, i32, i32
  }
}

module attributes {stable_mosaic.version = 11 : i64} {
  func.func @_mask_head_kernel(%arg0: i32, %arg1: memref<1x24x32xf32, #tpu.memory_space<vmem>>, %arg2: memref<1x32xf32, #tpu.memory_space<vmem>>, %arg3: memref<1x32xf32, #tpu.memory_space<vmem>>, %arg4: memref<32x32xbf16, #tpu.memory_space<vmem>>, %arg5: memref<32x32xbf16, #tpu.memory_space<vmem>>, %arg6: memref<8x1xf32, #tpu.memory_space<vmem>>, %arg7: memref<8x1xf32, #tpu.memory_space<vmem>>, %arg8: memref<1x8x16xf32, #tpu.memory_space<vmem>>) attributes {dimension_semantics = [#tpu.dimension_semantics<parallel>], iteration_bounds = array<i64: 2>, scalar_prefetch = 0 : i64, scratch_operands = 0 : i64, tpu.core_type = #tpu.core_type<tc>, window_params = [{transform_indices = @transform_0, window_bounds = array<i64: 1, 24, 32>}, {pipeline_mode = #tpu.pipeline_mode<synchronous>, transform_indices = @transform_1, window_bounds = array<i64: 1, 32>}, {pipeline_mode = #tpu.pipeline_mode<synchronous>, transform_indices = @transform_2, window_bounds = array<i64: 1, 32>}, {pipeline_mode = #tpu.pipeline_mode<synchronous>, transform_indices = @transform_3, window_bounds = array<i64: 32, 32>}, {pipeline_mode = #tpu.pipeline_mode<synchronous>, transform_indices = @transform_4, window_bounds = array<i64: 32, 32>}, {pipeline_mode = #tpu.pipeline_mode<synchronous>, transform_indices = @transform_5, window_bounds = array<i64: 8, 1>}, {pipeline_mode = #tpu.pipeline_mode<synchronous>, transform_indices = @transform_6, window_bounds = array<i64: 8, 1>}, {transform_indices = @transform_7, window_bounds = array<i64: 1, 8, 16>}]} {
    %c0 = arith.constant 0 : index
    %c0_0 = arith.constant 0 : index
    %c0_1 = arith.constant 0 : index
    %0 = vector.load %arg1[%c0, %c0_0, %c0_1] : memref<1x24x32xf32, #tpu.memory_space<vmem>>, vector<1x24x32xf32>
    %1 = vector.shape_cast %0 : vector<1x24x32xf32> to vector<24x32xf32>
    %c0_2 = arith.constant 0 : index
    %c0_3 = arith.constant 0 : index
    %2 = vector.load %arg2[%c0_2, %c0_3] : memref<1x32xf32, #tpu.memory_space<vmem>>, vector<1x32xf32>
    %c0_4 = arith.constant 0 : index
    %c0_5 = arith.constant 0 : index
    %3 = vector.load %arg3[%c0_4, %c0_5] : memref<1x32xf32, #tpu.memory_space<vmem>>, vector<1x32xf32>
    %cst = arith.constant dense<0.000000e+00> : vector<24xf32>
    %4 = vector.multi_reduction <add>, %1, %cst [1] : vector<24x32xf32> to vector<24xf32>
    %5 = vector.shape_cast %4 : vector<24xf32> to vector<24x1xf32>
    %cst_6 = arith.constant 3.200000e+01 : f32
    %6 = vector.broadcast %cst_6 : f32 to vector<24x1xf32>
    %7 = arith.divf %5, %6 : vector<24x1xf32>
    %8 = vector.broadcast %7 : vector<24x1xf32> to vector<24x32xf32>
    %9 = arith.subf %1, %8 : vector<24x32xf32>
    %10 = arith.mulf %9, %9 : vector<24x32xf32>
    %cst_7 = arith.constant dense<0.000000e+00> : vector<24xf32>
    %11 = vector.multi_reduction <add>, %10, %cst_7 [1] : vector<24x32xf32> to vector<24xf32>
    %12 = vector.shape_cast %11 : vector<24xf32> to vector<24x1xf32>
    %cst_8 = arith.constant 3.200000e+01 : f32
    %13 = vector.broadcast %cst_8 : f32 to vector<24x1xf32>
    %14 = arith.divf %12, %13 : vector<24x1xf32>
    %15 = vector.broadcast %7 : vector<24x1xf32> to vector<24x32xf32>
    %16 = arith.subf %1, %15 : vector<24x32xf32>
    %cst_9 = arith.constant 9.99999974E-6 : f32
    %17 = vector.broadcast %cst_9 : f32 to vector<24x1xf32>
    %18 = arith.addf %14, %17 : vector<24x1xf32>
    %19 = math.rsqrt %18 : vector<24x1xf32>
    %20 = vector.broadcast %19 : vector<24x1xf32> to vector<24x32xf32>
    %21 = arith.mulf %16, %20 : vector<24x32xf32>
    %22 = vector.broadcast %2 : vector<1x32xf32> to vector<24x32xf32>
    %23 = arith.mulf %21, %22 : vector<24x32xf32>
    %24 = vector.broadcast %3 : vector<1x32xf32> to vector<24x32xf32>
    %25 = arith.addf %23, %24 : vector<24x32xf32>
    %26 = arith.truncf %25 : vector<24x32xf32> to vector<24x32xbf16>
    %27 = vector.extract_strided_slice %26 {offsets = [0, 0], sizes = [16, 32], strides = [1, 1]} : vector<24x32xbf16> to vector<16x32xbf16>
    %c0_10 = arith.constant 0 : index
    %c0_11 = arith.constant 0 : index
    %28 = vector.load %arg4[%c0_10, %c0_11] : memref<32x32xbf16, #tpu.memory_space<vmem>>, vector<32x32xbf16>
    %cst_12 = arith.constant dense<0.000000e+00> : vector<16x32xf32>
    %29 = tpu.matmul %27, %28, %cst_12 {dimension_numbers = #tpu.dot_dimension_numbers<[1], [0], [0], [1], [0, 0, 1, 1], [], []>} : vector<16x32xbf16>, vector<32x32xbf16>, vector<16x32xf32> -> vector<16x32xf32>
    %30 = vector.extract_strided_slice %26 {offsets = [16, 0], sizes = [8, 32], strides = [1, 1]} : vector<24x32xbf16> to vector<8x32xbf16>
    %c0_13 = arith.constant 0 : index
    %c0_14 = arith.constant 0 : index
    %31 = vector.load %arg5[%c0_13, %c0_14] : memref<32x32xbf16, #tpu.memory_space<vmem>>, vector<32x32xbf16>
    %cst_15 = arith.constant dense<0.000000e+00> : vector<8x32xf32>
    %32 = tpu.matmul %30, %31, %cst_15 {dimension_numbers = #tpu.dot_dimension_numbers<[1], [0], [0], [1], [0, 0, 1, 1], [], []>} : vector<8x32xbf16>, vector<32x32xbf16>, vector<8x32xf32> -> vector<8x32xf32>
    %33 = arith.mulf %29, %29 : vector<16x32xf32>
    %cst_16 = arith.constant dense<0.000000e+00> : vector<16xf32>
    %34 = vector.multi_reduction <add>, %33, %cst_16 [1] : vector<16x32xf32> to vector<16xf32>
    %35 = vector.shape_cast %34 : vector<16xf32> to vector<16x1xf32>
    %cst_17 = arith.constant 1.000000e-24 : f32
    %36 = vector.broadcast %cst_17 : f32 to vector<16x1xf32>
    %37 = arith.maximumf %35, %36 : vector<16x1xf32>
    %38 = math.rsqrt %37 : vector<16x1xf32>
    %39 = vector.broadcast %38 : vector<16x1xf32> to vector<16x32xf32>
    %40 = arith.mulf %29, %39 : vector<16x32xf32>
    %41 = arith.mulf %32, %32 : vector<8x32xf32>
    %cst_18 = arith.constant dense<0.000000e+00> : vector<8xf32>
    %42 = vector.multi_reduction <add>, %41, %cst_18 [1] : vector<8x32xf32> to vector<8xf32>
    %43 = vector.shape_cast %42 : vector<8xf32> to vector<8x1xf32>
    %cst_19 = arith.constant 1.000000e-24 : f32
    %44 = vector.broadcast %cst_19 : f32 to vector<8x1xf32>
    %45 = arith.maximumf %43, %44 : vector<8x1xf32>
    %46 = math.rsqrt %45 : vector<8x1xf32>
    %47 = vector.broadcast %46 : vector<8x1xf32> to vector<8x32xf32>
    %48 = arith.mulf %32, %47 : vector<8x32xf32>
    %49 = arith.truncf %48 : vector<8x32xf32> to vector<8x32xbf16>
    %50 = arith.truncf %40 : vector<16x32xf32> to vector<16x32xbf16>
    %cst_20 = arith.constant dense<0.000000e+00> : vector<8x16xf32>
    %51 = tpu.matmul %49, %50, %cst_20 {dimension_numbers = #tpu.dot_dimension_numbers<[1], [1], [0], [0], [0, 0, 1, 0], [], []>} : vector<8x32xbf16>, vector<16x32xbf16>, vector<8x16xf32> -> vector<8x16xf32>
    %cst_21 = arith.constant dense<0.000000e+00> : vector<16xf32>
    %52 = vector.multi_reduction <add>, %51, %cst_21 [0] : vector<8x16xf32> to vector<16xf32>
    %53 = vector.shape_cast %52 : vector<16xf32> to vector<1x16xf32>
    %cst_22 = arith.constant 8.000000e+00 : f32
    %54 = vector.broadcast %cst_22 : f32 to vector<1x16xf32>
    %55 = arith.divf %53, %54 : vector<1x16xf32>
    %56 = vector.broadcast %55 : vector<1x16xf32> to vector<8x16xf32>
    %57 = arith.subf %51, %56 : vector<8x16xf32>
    %58 = arith.mulf %57, %57 : vector<8x16xf32>
    %cst_23 = arith.constant dense<0.000000e+00> : vector<16xf32>
    %59 = vector.multi_reduction <add>, %58, %cst_23 [0] : vector<8x16xf32> to vector<16xf32>
    %60 = vector.shape_cast %59 : vector<16xf32> to vector<1x16xf32>
    %cst_24 = arith.constant 8.000000e+00 : f32
    %61 = vector.broadcast %cst_24 : f32 to vector<1x16xf32>
    %62 = arith.divf %60, %61 : vector<1x16xf32>
    %63 = vector.broadcast %55 : vector<1x16xf32> to vector<8x16xf32>
    %64 = arith.subf %51, %63 : vector<8x16xf32>
    %cst_25 = arith.constant 9.99999974E-6 : f32
    %65 = vector.broadcast %cst_25 : f32 to vector<1x16xf32>
    %66 = arith.addf %62, %65 : vector<1x16xf32>
    %67 = math.rsqrt %66 : vector<1x16xf32>
    %68 = vector.broadcast %67 : vector<1x16xf32> to vector<8x16xf32>
    %69 = arith.mulf %64, %68 : vector<8x16xf32>
    %c0_26 = arith.constant 0 : index
    %c0_27 = arith.constant 0 : index
    %70 = vector.load %arg6[%c0_26, %c0_27] : memref<8x1xf32, #tpu.memory_space<vmem>>, vector<8x1xf32>
    %71 = vector.broadcast %70 : vector<8x1xf32> to vector<8x16xf32>
    %72 = arith.mulf %69, %71 : vector<8x16xf32>
    %c0_28 = arith.constant 0 : index
    %c0_29 = arith.constant 0 : index
    %73 = vector.load %arg7[%c0_28, %c0_29] : memref<8x1xf32, #tpu.memory_space<vmem>>, vector<8x1xf32>
    %74 = vector.broadcast %73 : vector<8x1xf32> to vector<8x16xf32>
    %75 = arith.addf %72, %74 : vector<8x16xf32>
    %c0_30 = arith.constant 0 : index
    %c0_31 = arith.constant 0 : index
    %c0_32 = arith.constant 0 : index
    %76 = vector.load %arg8[%c0_30, %c0_31, %c0_32] : memref<1x8x16xf32, #tpu.memory_space<vmem>>, vector<1x8x16xf32>
    %77 = vector.shape_cast %76 : vector<1x8x16xf32> to vector<8x16xf32>
    %78 = vector.shape_cast %75 : vector<8x16xf32> to vector<1x8x16xf32>
    tpu.vector_store %arg8[%c0_30, %c0_31, %c0_32], %78 {strides = array<i32>} : memref<1x8x16xf32, #tpu.memory_space<vmem>>, vector<1x8x16xf32>,
    return
  }
  func.func @transform_0(%arg0: i32) -> (i32, i32, i32) {
    %c0_i32 = arith.constant 0 : i32
    %c0_i32_0 = arith.constant 0 : i32
    %c0_i32_1 = arith.constant 0 : i32
    return %arg0, %c0_i32, %c0_i32_0 : i32, i32, i32
  }
  func.func @transform_1(%arg0: i32) -> (i32, i32) {
    %c0_i32 = arith.constant 0 : i32
    %c0_i32_0 = arith.constant 0 : i32
    %c0_i32_1 = arith.constant 0 : i32
    return %c0_i32, %c0_i32_0 : i32, i32
  }
  func.func @transform_2(%arg0: i32) -> (i32, i32) {
    %c0_i32 = arith.constant 0 : i32
    %c0_i32_0 = arith.constant 0 : i32
    %c0_i32_1 = arith.constant 0 : i32
    return %c0_i32, %c0_i32_0 : i32, i32
  }
  func.func @transform_3(%arg0: i32) -> (i32, i32) {
    %c0_i32 = arith.constant 0 : i32
    %c0_i32_0 = arith.constant 0 : i32
    %c0_i32_1 = arith.constant 0 : i32
    return %c0_i32, %c0_i32_0 : i32, i32
  }
  func.func @transform_4(%arg0: i32) -> (i32, i32) {
    %c0_i32 = arith.constant 0 : i32
    %c0_i32_0 = arith.constant 0 : i32
    %c0_i32_1 = arith.constant 0 : i32
    return %c0_i32, %c0_i32_0 : i32, i32
  }
  func.func @transform_5(%arg0: i32) -> (i32, i32) {
    %c0_i32 = arith.constant 0 : i32
    %c0_i32_0 = arith.constant 0 : i32
    %c0_i32_1 = arith.constant 0 : i32
    return %c0_i32, %c0_i32_0 : i32, i32
  }
  func.func @transform_6(%arg0: i32) -> (i32, i32) {
    %c0_i32 = arith.constant 0 : i32
    %c0_i32_0 = arith.constant 0 : i32
    %c0_i32_1 = arith.constant 0 : i32
    return %c0_i32, %c0_i32_0 : i32, i32
  }
  func.func @transform_7(%arg0: i32) -> (i32, i32, i32) {
    %c0_i32 = arith.constant 0 : i32
    %c0_i32_0 = arith.constant 0 : i32
    %c0_i32_1 = arith.constant 0 : i32
    return %arg0, %c0_i32, %c0_i32_0 : i32, i32, i32
  }
}

</mosaic_0001>

<bundles_post_ra>
// kernel: tpu_custom_call.1
= control target key start
LH: loop header
LB: loop body
LE: loop exit
PB: predicated region body
PF: predicated region fallthrough
CT: control target
= control target key end

     0   :  { %6 = vsyncpa [#allocation3], 0  ;;  %s482_s0 = inlined_call_operand.hbm [shape: f32[8,128], index: 0, kind: input, shape index: {}]   ;;  %s483_s1 = inlined_call_operand.hbm [shape: f32[16,128], index: 1, kind: output, shape index: {}]  }
   0x1   :  { %7 = vsyncpa [#allocation4], 0 }
   0x2   :  { %9 = vsyncpa [#allocation4 + $0x1], 0  ;;  %s352_s6 = smov 0   ;;  %s354_s7 = smov 0  }
   0x3   :  { %s356_s8 = smov 0   ;;  %s358_s9 = smov 0  }
   0x4 LB: > { %s373_s10 = sadd.s32 4294967295, %s338_s9   ;;  %s184_s11 = sadd.s32 4294967294, %s338_s9   ;;  %s338_s9 = sphi %s358_s9, %s499_s9   ;;  %s334_s8 = sphi %s356_s8, %s498_s8   ;;  %s330_s7 = sphi %s354_s7, %s497_s7   ;;  %s326_s6 = sphi %s352_s6, %s496_s6  }
   0x5   : > { %s377_s12 = sadd.s32 1, %s338_s9   ;;  %s43_s13 = sadd.s32 1, %s334_s8 }
   0x6   : > { %s40_s14 = ssub.s32 %s338_s9, %s377_s12  ;;  %p53_p0 = scmp.ne.s32.totalorder %s334_s8, %s330_s7 }
   0x7   : > { %p41_p1 = scmp.eq.s32.totalorder %s40_s14, 0  ;;  %p54_p2 = scmp.eq.s32.totalorder %s373_s10, 1 }
   0x8   : > { %p59_p3 = scmp.ne.s32.totalorder %s330_s7, %s326_s6  ;;  %p60_p4 = scmp.eq.s32.totalorder %s184_s11, 1 }
   0x9   : > { %s388_s15 = scalar_select %p41_p1, %s334_s8, %s43_s13  }
   0xa   : > { %p390_p5 = por %p54_p2, %p53_p0  ;;  %p394_p6 = por %p60_p4, %p59_p3 }
   0xb   : > { %p185_p7 = scmp.ge.s32.totalorder %s338_s9, 1  ;;  %p67_p8 = scmp.lt.s32.totalorder %s338_s9, 3 }
   0xc   : > { %s487_s16 = scalar_select %p390_p5, 1, 0 }
   0xd   : > { %s488_s17 = scalar_select %p394_p6, 1, 0 }
   0xe   : > { %p484_p9 = scmp.eq.s32.totalorder %s373_s10, 0  ;;  %p401_p10 = pnand %p185_p7, %p67_p8 }
   0xf   : > { %s340_s19 = smov [#allocation2]   ;;  %s244_s24 = scalar_lea.hbm %s482_s0, 128 }
  0x10   : > { %s489_s18 = scalar_select %p401_p10, 1, 0 }
  0x11   : > { %s80_s20 = sshll.u32 %s340_s19, 4  ;;  %p200_p11 = pneg %p401_p10  ;;  %s81_s20 = int_to_ptr.vmem [resolvable:$true] %s80_s20 }
  0x12   : > { %p245_p13 = scmp.ne.s32.totalorder %s482_s0, %s244_s24  ;;  %p251_p3 = scmp.lt.u32.totalorder %s244_s24, %s482_s0 }
  0x13   : > { %p409_p12 = pnand %p484_p9, %p200_p11 }
  0x15   : > { %p246_p0 = pneg %p409_p12 }
  0x17   : > { %p247_p1 = pnand %p246_p0, %p245_p13 }
  0x19   : > { %p248_p2 = pneg %p247_p1 }
  0x1b   : > { %p253_p4 = pnand %p251_p3, %p248_p2 }
  0x1d   : > { %256 = shalt.err (!%p253_p4)
}
  0x1e   : > { %s257_s29 = scalar_lea.vmem %s81_s20, 128  ;;  %p265_p9 = scmp.lt.s32.totalorder %s81_s20, %s81_s20 }
  0x1f   : > { %p258_p7 = scmp.ne.s32.totalorder %s81_s20, %s257_s29  ;;  %p266_p6 = scmp.lt.s32.totalorder %s257_s29, %s257_s29 }
  0x21   : > { %p260_p8 = pnand %p258_p7, %p246_p0  ;;  %p267_p5 = por %p266_p6, %p265_p9 }
  0x23   : > { %p261_p11 = pneg %p260_p8 }
  0x25   : > { %p268_p10 = pnand %p267_p5, %p261_p11 }
  0x27   : > { %271 = shalt.err (!%p268_p10)
}
  0x28   : > { %203 = dma.hbm_to_vmem [thread:$0]  (!%p409_p12), %s482_s0, 128, %s81_s20, [#allocation3]  }
  0x29   : > { %p491_p13 = scmp.ne.s32.totalorder %s489_s18, 0 }
  0x2a   : > { %p492_p1 = scmp.eq.s32.totalorder (!%p491_p13), %s373_s10, 0 }
  0x2b   : > { %93 = sbr.rel (%p491_p13) target bundleno = 77 (0x4d), region = 24 }
  0x32   : > { %317 = dma.done.wait (%p492_p1), [#allocation3], 128   ;;  %p493_p0 = pmov %p492_p1 }
  0x33   : > { %s105_s3 = sand.u32 1, %s330_s7   ;;  %s191_s13 = sshll.u32 %s373_s10, 7  ;;  %v108_v0 = vld [vmem:[#allocation2] sm:$0xff] }
  0x34   : > { %319 = vsyncadd (%p493_p0), [#allocation3], 4294967168  ;;  %s189_s4 = sshll.u32 %s105_s3, 3  ;;  %v109_v1 = vadd.f32 1.0, %v108_v0  ;;  %s442_s19 = scalar_lea.hbm %s483_s1, %s191_s13 }
  0x35   : > { %s107_s5 = scalar_lea.vmem [#allocation5], %s189_s4  ;;  %s112_s20 = scalar_lea.sflag [#allocation4], %s105_s3 }
  0x36   : > { %s125_s11 = sshll.u32 %s107_s5, 4  ;;  %110 = vst [vmem:[%s107_s5] sm:$0xff] %v109_v1  ;;  %p494_p6 = scmp.ne.s32.totalorder %s487_s16, 0  ;;  %s437_s11 = int_to_ptr.vmem [resolvable:$true] %s125_s11 }
  0x37   : > { %s272_s21 = scalar_lea.vmem %s437_s11, 128  ;;  %s341_s10 = smov [#allocation5]  }
  0x38   : > { %p273_p5 = scmp.ne.s32.totalorder %s437_s11, %s272_s21  ;;  %s276_s22 = sshll.u32 %s341_s10, 4  ;;  %s277_s22 = int_to_ptr.vmem [resolvable:$false] %s276_s22 }
  0x39   : > { %s278_s23 = scalar_lea.vmem %s277_s22, 256  ;;  %p279_p12 = scmp.lt.s32.totalorder %s437_s11, %s277_s22 }
  0x3a   : > { %p274_p9 = pnand %p273_p5, %p494_p6  ;;  %p280_p2 = scmp.lt.s32.totalorder %s278_s23, %s272_s21 }
  0x3c   : > { %p275_p10 = pneg %p274_p9  ;;  %p281_p3 = por %p280_p2, %p279_p12 }
  0x3e   : > { %p282_p4 = pnand %p281_p3, %p275_p10 }
  0x40   : > { %285 = shalt.err (!%p282_p4)
}
  0x41   : > { %s286_s24 = scalar_lea.hbm %s442_s19, 128  ;;  %s290_s27 = scalar_lea.hbm %s483_s1, 256 }
  0x42   : > { %p287_p7 = scmp.ne.s32.totalorder %s442_s19, %s286_s24  ;;  %p291_p13 = scmp.lt.u32.totalorder %s442_s19, %s483_s1 }
  0x43   : > { %p292_p1 = scmp.lt.u32.totalorder %s290_s27, %s286_s24  ;;  %p294_p5 = scmp.lt.u32.totalorder %s286_s24, %s442_s19 }
  0x44   : > { %p288_p8 = pnand %p287_p7, %p494_p6 }
  0x45   : > { %p293_p0 = por %p292_p1, %p291_p13 }
  0x46   : > { %p289_p11 = pneg %p288_p8 }
  0x47   : > { %p295_p9 = por %p294_p5, %p293_p0 }
  0x49   : > { %p296_p10 = pnand %p295_p9, %p289_p11 }
  0x4b   : > { %299 = shalt.err (!%p296_p10)
}
  0x4c   : > { %198 = dma.vmem_to_hbm [thread:$0]  (%p494_p6), %s437_s11, 128, %s442_s19, %s112_s20  }
  0x4d PF: > { %p210_p12 = scmp.ge.s32.totalorder %s338_s9, 2  ;;  %s137_s30 = sand.u32 1, %s326_s6  }
  0x4e   : > { %p495_p2 = scmp.ne.s32.totalorder %s488_s17, 0  ;;  %s138_s2 = scalar_lea.sflag [#allocation4], %s137_s30 }
  0x50   : > { %p205_p3 = pnand %p210_p12, %p495_p2 }
  0x52   : > { %321 = dma.done.wait (!%p205_p3), %s138_s2, 128  }
  0x53   : > { %323 = vsyncadd (!%p205_p3), %s138_s2, 4294967168  ;;  %p12_p4 = scmp.ge.s32.totalorder %s377_s12, 4   ;;  %s496_s6 = smov %s330_s7 }
  0x54   : > { %s497_s7 = smov %s334_s8  ;;  %s498_s8 = smov %s388_s15 }
  0x55   : > { %s499_s9 = smov %s377_s12  ;;  %14 = sbr.rel (!%p12_p4) target bundleno = 4 (0x4), region = 61 }
  0x5c   :  { %143 = vsyncpa [#allocation3], 1 }
  0x5d   :  { %145 = vsyncpa [#allocation3 + $0x1], 1 }
  0x5e   :  { %146 = vsyncpa [#allocation4], 1 }
  0x5f   :  { %148 = vsyncpa [#allocation4 + $0x1], 1 }

// kernel: mask_transformer_forward.3
= control target key start
LH: loop header
LB: loop body
LE: loop exit
PB: predicated region body
PF: predicated region fallthrough
CT: control target
= control target key end

     0   :  { %vm44_vm0 = vcmask 261120   ;;  %s186_s1 = inlined_call_operand.vmem [shape: bf16[32,32], index: 1, kind: input, shape index: {}]   ;;  %s187_s0 = inlined_call_operand.vmem [shape: f32[32,32], index: 0, kind: input, shape index: {}]   ;;  %s188_s2 = inlined_call_operand.vmem [shape: f32[1,32], index: 2, kind: input, shape index: {}]   ;;  %s189_s3 = inlined_call_operand.vmem [shape: f32[32,32], index: 3, kind: output, shape index: {}]  }
   0x1   :  { %v125_v0 = vld [vmem:[%s186_s1] sm:$0xff]   ;;  %v126_v1 = vld [vmem:[%s186_s1 + $0x8] sm:$0xff]   ;;  %v17_v5 = vld [vmem:[%s187_s0 + $0x10] sm:$0xff] }
   0x2   :  { %117 = vmatprep.subr.bf16.mxu0 %v125_v0  ;;  %v15_v2 = vld [vmem:[%s187_s0] sm:$0xff]  ;;  %v16_v3 = vld [vmem:[%s187_s0 + $0x8] sm:$0xff]  ;;  %v18_v6 = vld [vmem:[%s187_s0 + $0x18] sm:$0xff] }
   0x3   :  { %118 = vmatpush3.bf16.msra.mxu0 %v125_v0  ;;  %v19_v4 = vpack.c.bf16 %v16_v3, %v15_v2  ;;  %v20_v7 = vpack.c.bf16 %v18_v6, %v17_v5  ;;  %v108_v8 = vld [vmem:[%s188_s2] ss:$0 sm:$0xff] }
   0x4   :  { %119 = vmatprep.subr.bf16.mxu0 %v126_v1 }
   0x5   :  { %121 = vmatprep.mubr.msk.bf16.mxu0 %vm44_vm0, %v19_v4 }
   0x7   :  { %120 = vmatpush3.bf16.msra.mxu0 %v126_v1 }
   0xa   :  { %122 = vmatmul.mubr.msk.bf16.vlgmr.msra.gmra.mrb[0].mxu0 %vm44_vm0, %v20_v7 }
  0xdd   :  { %v123_v9 = vpop.f32.mrb[0].mxu0 }
  0xde   :  { %v94_v10 = vadd.f32 %v123_v9, %v108_v8  ;;  %v85_v11 = vpop.f32.mrb[1].mxu0 }
  0xdf   :  { %v86_v12 = vadd.f32 %v108_v8, %v85_v11  ;;  %v124_v13 = vpop.f32.mrb[2].mxu0 }
  0xe0   :  { %102 = vst.msk [vmem:[%s189_s3 + $0x10] sm:$0xff] %vm44_vm0, %v94_v10  ;;  %v97_v14 = vadd.f32 %v124_v13, %v108_v8  ;;  %v88_v15 = vpop.f32.mrb[3].mxu0 }
  0xe1   :  { %100 = vst.msk [vmem:[%s189_s3] sm:$0xff] %vm44_vm0, %v86_v12  ;;  %v89_v16 = vadd.f32 %v108_v8, %v88_v15 }
  0xe2   :  { %103 = vst.msk [vmem:[%s189_s3 + $0x18] sm:$0xff] %vm44_vm0, %v97_v14 }
  0xe3   :  { %101 = vst.msk [vmem:[%s189_s3 + $0x8] sm:$0xff] %vm44_vm0, %v89_v16 }

// kernel: mask_transformer_forward.5
= control target key start
LH: loop header
LB: loop body
LE: loop exit
PB: predicated region body
PF: predicated region fallthrough
CT: control target
= control target key end

     0   :  { %s754_s24 = smov 0   ;;  %s818_s0 = inlined_call_operand.vmem [shape: f32[2,24,32], index: 0, kind: input, shape index: {}]   ;;  %s819_s1 = inlined_call_operand.vmem [shape: f32[1,32], index: 1, kind: input, shape index: {}]   ;;  %s820_s2 = inlined_call_operand.vmem [shape: f32[1,32], index: 2, kind: input, shape index: {}]   ;;  %s821_s3 = inlined_call_operand.vmem [shape: bf16[32,32], index: 3, kind: input, shape index: {}]   ;;  %s822_s4 = inlined_call_operand.vmem [shape: bf16[32,32], index: 4, kind: input, shape index: {}]   ;;  %s823_s5 = inlined_call_operand.vmem [shape: f32[8,1], index: 5, kind: input, shape index: {}]   ;;  %s824_s6 = inlined_call_operand.vmem [shape: f32[8,1], index: 6, kind: input, shape index: {}]   ;;  %s825_s7 = inlined_call_operand.vmem [shape: f32[2,8,16], index: 7, kind: output, shape index: {}]  }
   0x1 LB: > { %s623_s25 = sadd.s32 4294967295, %s709_s24   ;;  %p627_p0 = scmp.ge.s32.totalorder %s709_s24, 1  ;;  %s709_s24 = sphi %s754_s24, %s17_s24  }
   0x2   : > { %p237_p1 = scmp.lt.s32.totalorder %s709_s24, 3 }
   0x4   : > { %p238_p2 = pnand %p627_p0, %p237_p1 }
   0x5   : > { %p268_p3 = scmp.lt.s32.totalorder (!%p238_p2), %s623_s25, 1  ;;  %vm283_vm0 = vcmask (!%p238_p2), 261120   ;;  %v685_v21 = vld [vmem:[%s821_s3] sm:$0xff] (!%p238_p2)   ;;  %v711_v23 = vmov (!%p238_p2), 0.0   ;;  %v687_v24 = vld [vmem:[%s821_s3 + $0x8] sm:$0xff] (!%p238_p2)   ;;  %vm712_vm1 = vmmov (!%p238_p2), 0  }
   0x6   : > { %241 = sbr.rel (%p238_p2) target bundleno = 988 (0x3dc), region = 48  ;;  %v686_v22 = vld [vmem:[%s822_s4] sm:$0xff] (!%p238_p2)   ;;  %649 = vmatprep.subr.bf16.mxu0 (!%p238_p2), %v711_v23  ;;  %657 = vmatprep.subr.bf16.mxu1 (!%p238_p2), %v711_v23  ;;  %v688_v25 = vld [vmem:[%s822_s4 + $0x8] sm:$0xff] (!%p238_p2)   ;;  %vm532_vm2 = vcmask (!%p238_p2), 130048  }
   0x7   : > { %650 = vmatpush3.bf16.msra.mxu0 (!%p238_p2), %v685_v21  ;;  %658 = vmatpush3.bf16.msra.mxu1 (!%p238_p2), %v686_v22  ;;  %v630_v37 = vld [vmem:[%s819_s1] ss:$0 sm:$0xff] (!%p238_p2) }
   0x8   : > { %651 = vmatprep.subr.bf16.mxu0 (!%p238_p2), %v711_v23  ;;  %659 = vmatprep.subr.bf16.mxu1 (!%p238_p2), %v711_v23  ;;  %v631_v43 = vld [vmem:[%s820_s2] ss:$0 sm:$0xff] (!%p238_p2) }
   0x9   : > { %653 = vmatprep.mubr.msk.bf16.mxu0 (!%p238_p2), %vm712_vm1, %v711_v23  ;;  %661 = vmatprep.mubr.msk.bf16.mxu1 (!%p238_p2), %vm712_vm1, %v711_v23 }
   0xb   : > { %652 = vmatpush3.bf16.msra.mxu0 (!%p238_p2), %v687_v24  ;;  %660 = vmatpush3.bf16.msra.mxu1 (!%p238_p2), %v688_v25 }
   0xc   : > { %665 = vmatprep.subr.bf16.mxu0 (!%p238_p2), %v711_v23 }
   0xd   : > { %s827_s25 = smov (!%p268_p3, %s623_s25), 1 }
   0xe   : > { %s671_s26 = smul.u32 24, %s827_s25  ;;  %s629_s23 = sshll.u32 %s827_s25, 3 }
   0xf   : > { %s276_s28 = scalar_lea.vmem %s825_s7, %s629_s23 }
  0x10   : > { %s272_s29 = scalar_lea.vmem %s818_s0, %s671_s26 }
  0x11   : > { %v278_v0 = vld [vmem:[%s272_s29] sm:$0xff]  ;;  %v280_v1 = vld [vmem:[%s272_s29 + $0x10] sm:$0xff]  ;;  %v279_v2 = vld [vmem:[%s272_s29 + $0x8] sm:$0xff] }
  0x12   : > { %v284_v3 = vsel %vm283_vm0, %v278_v0, 0.0  ;;  %v290_v4 = vsel %vm283_vm0, %v280_v1, 0.0  ;;  %v287_v5 = vsel %vm283_vm0, %v279_v2, 0.0 }
  0x13   : > { %285 = vadd.xlane.f32.xlu0 %v284_v3  ;;  %291 = vadd.xlane.f32.xlu1 %v290_v4  ;;  %v713_v3 = vmov 0  }
  0x14   : > { %683 = vset.pattern.permute.xlu1 %v713_v3  ;;  %684 = vset.pattern.permute.xlu0 %v713_v3 }
  0x17   : > { %288 = vadd.xlane.f32.xlu0 %v287_v5 }
  0xa0   : > { %v286_v6 = vpop.xlane.xlu0 %285  ;;  %v292_v7 = vpop.xlane.xlu1 %291 }
  0xa1   : > { %v294_v8 = vmul.f32 0.03125, %v286_v6  ;;  %v296_v9 = vmul.f32 0.03125, %v292_v7 }
  0xa3   : > { %v297_v10 = vsub.f32 %v278_v0, %v294_v8  ;;  %v299_v11 = vsub.f32 %v280_v1, %v296_v9  ;;  %v555_v1 = vld [vmem:[%s823_s5] sm:$0xff] }
  0xa4   : > { %v289_v12 = vpop.xlane.xlu0 %288 }
  0xa5   : > { %v295_v13 = vmul.f32 0.03125, %v289_v12  ;;  %v300_v14 = vmul.f32 %v297_v10, %v297_v10  ;;  %v302_v15 = vmul.f32 %v299_v11, %v299_v11 }
  0xa7   : > { %v298_v16 = vsub.f32 %v279_v2, %v295_v13  ;;  %v303_v17 = vsel %vm283_vm0, %v300_v14, 0.0  ;;  %v309_v18 = vsel %vm283_vm0, %v302_v15, 0.0  ;;  %v562_v2 = vld [vmem:[%s824_s6] sm:$0xff] }
  0xa8   : > { %304 = vadd.xlane.f32.xlu1 %v303_v17 }
  0xa9   : > { %v301_v19 = vmul.f32 %v298_v16, %v298_v16 }
  0xab   : > { %v306_v20 = vsel %vm283_vm0, %v301_v19, 0.0 }
  0xac   : > { %310 = vadd.xlane.f32.xlu1 %v309_v18  ;;  %307 = vadd.xlane.f32.xlu0 %v306_v20 }
 0x135   : > { %v305_v26 = vpop.xlane.xlu1 %304 }
 0x136   : > { %v312_v27 = vmul.f32 0.03125, %v305_v26 }
 0x138   : > { %v315_v28 = vadd.f32 1e-05, %v312_v27 }
 0x139   : > { %v311_v29 = vpop.xlane.xlu1 %310  ;;  %v308_v30 = vpop.xlane.xlu0 %307 }
 0x13a   : > { %689 = vrsqrt.f32 %v315_v28  ;;  %v314_v31 = vmul.f32 0.03125, %v311_v29  ;;  %v313_v32 = vmul.f32 0.03125, %v308_v30 }
 0x13c   : > { %v317_v33 = vadd.f32 1e-05, %v314_v31  ;;  %v316_v34 = vadd.f32 1e-05, %v313_v32 }
 0x13e   : > { %691 = vrsqrt.f32 %v317_v33 }
 0x13f   : > { %693 = vrsqrt.f32 %v316_v34 }
 0x144   : > { %v690_v35 = vpop.eup %689 }
 0x145   : > { %v321_v36 = vmul.f32 %v690_v35, %v297_v10 }
 0x147   : > { %v330_v42 = vmul.f32 %v630_v37, %v321_v36 }
 0x148   : > { %v692_v38 = vpop.eup %691 }
 0x149   : > { %v694_v39 = vpop.eup %693  ;;  %v323_v40 = vmul.f32 %v692_v38, %v299_v11  ;;  %v339_v47 = vadd.f32 %v631_v43, %v330_v42 }
 0x14a   : > { %v322_v41 = vmul.f32 %v694_v39, %v298_v16 }
 0x14b   : > { %v332_v44 = vmul.f32 %v630_v37, %v323_v40 }
 0x14c   : > { %v331_v45 = vmul.f32 %v630_v37, %v322_v41 }
 0x14d   : > { %v341_v46 = vadd.f32 %v631_v43, %v332_v44 }
 0x14e   : > { %v340_v48 = vadd.f32 %v631_v43, %v331_v45 }
 0x14f   : > { %v343_v49 = vpack.c.bf16 %v341_v46, %v341_v46 }
 0x150   : > { %v342_v50 = vpack.c.bf16 %v340_v48, %v339_v47 }
 0x151   : > { %662 = vmatmul.mubr.msk.bf16.vlgmr.msra.gmra.mrb[0].mxu1 %vm283_vm0, %v343_v49 }
 0x152   : > { %654 = vmatmul.mubr.msk.bf16.vlgmr.msra.gmra.mrb[0].mxu0 %vm283_vm0, %v342_v50 }
 0x153   : > { %667 = vmatprep.mubr.msk.bf16.mxu0 %vm712_vm1, %v711_v23 }
 0x224   : > { %v457_v51 = vpop.f32.mrb[0].mxu1 }
 0x225   : > { %v397_v52 = vpop.f32.mrb[0].mxu0  ;;  %v663_v53 = vpop.f32.mrb[1].mxu1  ;;  %v477_v59 = vmul.f32 %v457_v51, %v457_v51 }
 0x226   : > { %v463_v54 = vmul.f32 %v397_v52, %v397_v52  ;;  %v655_v55 = vpop.f32.mrb[1].mxu0  ;;  %v460_v56 = vpop.f32.mrb[2].mxu1 }
 0x227   : > { %v400_v57 = vpop.f32.mrb[2].mxu0  ;;  %v664_v58 = vpop.f32.mrb[3].mxu1  ;;  %v478_v0 = vsel %vm283_vm0, %v477_v59, 0.0 }
 0x228   : > { %v464_v60 = vmul.f32 %v400_v57, %v400_v57  ;;  %v656_v61 = vpop.f32.mrb[3].mxu0  ;;  %v465_v62 = vsel %vm283_vm0, %v463_v54, 0.0 }
 0x229   : > { %466 = vadd.xlane.f32.xlu0 %v465_v62 }
 0x22a   : > { %v468_v63 = vsel %vm283_vm0, %v464_v60, 0.0 }
 0x22b   : > { %469 = vadd.xlane.f32.xlu1 %v468_v63 }
 0x22d   : > { %479 = vadd.xlane.f32.xlu0 %v478_v0 }
 0x23c   : > { %558 = vperm.xlu1 %683, %v555_v1  }
 0x243   : > { %565 = vperm.xlu0 %684, %v562_v2  }
 0x2b6   : > { %v467_v4 = vpop.xlane.xlu0 %466 }
 0x2b7   : > { %v471_v5 = vmax.f32 %v467_v4, 1e-24 }
 0x2b8   : > { %v470_v6 = vpop.xlane.xlu1 %469 }
 0x2b9   : > { %695 = vrsqrt.f32 %v471_v5  ;;  %v472_v7 = vmax.f32 %v470_v6, 1e-24 }
 0x2ba   : > { %v480_v8 = vpop.xlane.xlu0 %479 }
 0x2bb   : > { %697 = vrsqrt.f32 %v472_v7  ;;  %v481_v9 = vmax.f32 %v480_v8, 1e-24 }
 0x2bc   : > { %v559_v43 = vpop.permute.xlu1 %558 }
 0x2bd   : > { %699 = vrsqrt.f32 %v481_v9 }
 0x2c2   : > { %v566_v45 = vpop.permute.xlu0 %565 }
 0x2c3   : > { %v696_v10 = vpop.eup %695 }
 0x2c4   : > { %v475_v12 = vmul.f32 %v696_v10, %v397_v52 }
 0x2c5   : > { %v698_v11 = vpop.eup %697 }
 0x2c6   : > { %v476_v13 = vmul.f32 %v698_v11, %v400_v57 }
 0x2c7   : > { %v700_v15 = vpop.eup %699 }
 0x2c8   : > { %v485_v14 = vpack.c.bf16 %v476_v13, %v475_v12  ;;  %v483_v17 = vmul.f32 %v700_v15, %v457_v51 }
 0x2ca   : > { %v490_v16 = vsel %vm283_vm0, %v485_v14, 0  ;;  %v484_v18 = vpack.c.bf16 %v483_v17, %v483_v17 }
 0x2cb   : > { %666 = vmatpush3.bf16.xpose.msra.mxu0 %v490_v16 }
 0x2d2   : > { %668 = vmatmul.mubr.msk.bf16.vlgmr.msra.gmra.mrb[4].mxu0 %vm283_vm0, %v484_v18 }
 0x3a5   : > { %v526_v19 = vpop.f32.mrb[4].mxu0 }
 0x3a6   : > { %v533_v20 = vsel %vm532_vm2, %v526_v19, 0.0  ;;  %v669_v21 = vpop.f32.mrb[5].mxu0 }
 0x3a7   : > { %v534_v22 = vrot.slane %v533_v20, 4  ;;  %v529_v23 = vpop.f32.mrb[6].mxu0 }
 0x3a8   : > { %v670_v24 = vpop.f32.mrb[7].mxu0 }
 0x3a9   : > { %v535_v25 = vadd.f32 %v534_v22, %v533_v20 }
 0x3ab   : > { %v536_v26 = vrot.slane %v535_v25, 2 }
 0x3ad   : > { %v537_v27 = vadd.f32 %v536_v26, %v535_v25 }
 0x3af   : > { %v538_v28 = vrot.slane %v537_v27, 1 }
 0x3b1   : > { %v539_v29 = vadd.f32 %v538_v28, %v537_v27 }
 0x3b3   : > { %v541_v30 = vmul.f32 0.125, %v539_v29 }
 0x3b5   : > { %v542_v31 = vsub.f32 %v526_v19, %v541_v30 }
 0x3b7   : > { %v543_v32 = vmul.f32 %v542_v31, %v542_v31 }
 0x3b9   : > { %v544_v33 = vsel %vm532_vm2, %v543_v32, 0.0 }
 0x3ba   : > { %v545_v34 = vrot.slane %v544_v33, 4 }
 0x3bc   : > { %v546_v35 = vadd.f32 %v545_v34, %v544_v33 }
 0x3be   : > { %v547_v36 = vrot.slane %v546_v35, 2 }
 0x3c0   : > { %v548_v37 = vadd.f32 %v547_v36, %v546_v35 }
 0x3c2   : > { %v549_v38 = vrot.slane %v548_v37, 1 }
 0x3c4   : > { %v550_v39 = vadd.f32 %v549_v38, %v548_v37 }
 0x3c6   : > { %v551_v40 = vmul.f32 0.125, %v550_v39 }
 0x3c8   : > { %v552_v41 = vadd.f32 1e-05, %v551_v40 }
 0x3ca   : > { %701 = vrsqrt.f32 %v552_v41 }
 0x3d4   : > { %v702_v42 = vpop.eup %701 }
 0x3d5   : > { %v554_v44 = vmul.f32 %v702_v42, %v542_v31 }
 0x3d7   : > { %v561_v46 = vmul.f32 %v559_v43, %v554_v44 }
 0x3d9   : > { %v568_v47 = vadd.f32 %v566_v45, %v561_v46 }
 0x3db   : > { %569 = vst.msk [vmem:[%s276_s28] sm:$0xff] %vm532_vm2, %v568_v47 }
 0x3dc PF: > { %s17_s24 = sadd.s32 1, %s709_s24  }
 0x3dd   : > { %p14_p4 = scmp.ge.s32.totalorder %s17_s24, 4  }
 0x3df   :  { %16 = sbr.rel (!%p14_p4) target bundleno = 1 (0x1), region = 78 }

// kernel: mask_transformer_forward.4
= control target key start
LH: loop header
LB: loop body
LE: loop exit
PB: predicated region body
PF: predicated region fallthrough
CT: control target
= control target key end

     0   :  { %s2993_s24 = smov 0   ;;  %s2995_s25 = smov 0   ;;  %s3406_s0 = inlined_call_operand.vmem [shape: f32[2,24,32], index: 0, kind: input, shape index: {}]   ;;  %s3407_s1 = inlined_call_operand.vmem [shape: f32[2,1,32], index: 1, kind: input, shape index: {}]   ;;  %s3408_s2 = inlined_call_operand.vmem [shape: f32[2,1,32], index: 2, kind: input, shape index: {}]   ;;  %s3409_s3 = inlined_call_operand.vmem [shape: bf16[2,32,32], index: 3, kind: input, shape index: {}]   ;;  %s3410_s4 = inlined_call_operand.vmem [shape: bf16[2,32,32], index: 4, kind: input, shape index: {}]   ;;  %s3411_s5 = inlined_call_operand.vmem [shape: bf16[2,32,32], index: 5, kind: input, shape index: {}]   ;;  %s3412_s6 = inlined_call_operand.vmem [shape: f32[2,1,32], index: 6, kind: input, shape index: {}]   ;;  %s3413_s7 = inlined_call_operand.vmem [shape: f32[2,1,32], index: 7, kind: input, shape index: {}]   ;;  %s3414_s8 = inlined_call_operand.vmem [shape: f32[2,1,32], index: 8, kind: input, shape index: {}]   ;;  %s3415_s9 = inlined_call_operand.vmem [shape: bf16[2,32,32], index: 9, kind: input, shape index: {}]   ;;  %s3416_s10 = inlined_call_operand.vmem [shape: f32[2,1,32], index: 10, kind: input, shape index: {}]   ;;  %s3417_s11 = inlined_call_operand.vmem [shape: f32[2,1,32], index: 11, kind: input, shape index: {}]   ;;  %s3418_s12 = inlined_call_operand.vmem [shape: f32[2,1,32], index: 12, kind: input, shape index: {}]   ;;  %s3419_s13 = inlined_call_operand.vmem [shape: bf16[2,32,128], index: 13, kind: input, shape index: {}]   ;;  %s3420_s14 = inlined_call_operand.vmem [shape: f32[2,1,128], index: 14, kind: input, shape index: {}]   ;;  %s3421_s15 = inlined_call_operand.vmem [shape: bf16[2,128,32], index: 15, kind: input, shape index: {}]   ;;  %s3422_s16 = inlined_call_operand.vmem [shape: f32[2,1,32], index: 16, kind: input, shape index: {}]   ;;  %s3423_s17 = inlined_call_operand.vmem [shape: f32[2,24,32], index: 17, kind: output, shape index: {}]  }
   0x1   :  { %3429 = sst [smem:[#allocation9_spill]] %s3406_s0  ;;  %s2997_s26 = smov 0  }
   0x2   :  { %3430 = sst [smem:[#allocation10_spill]] %s3407_s1  ;;  %s2999_s27 = smov 0  }
   0x3   :  { %3431 = sst [smem:[#allocation11_spill]] %s3408_s2  ;;  %s3001_s28 = smov 0  }
   0x4   :  { %3432 = sst [smem:[#allocation12_spill]] %s3409_s3 }
   0x5   :  { %3433 = sst [smem:[#allocation13_spill]] %s3410_s4 }
   0x6   :  { %3434 = sst [smem:[#allocation14_spill]] %s3411_s5 }
   0x7   :  { %3435 = sst [smem:[#allocation15_spill]] %s3415_s9 }
   0x8   :  { %3436 = sst [smem:[#allocation16_spill]] %s3416_s10 }
   0x9   :  { %3437 = sst [smem:[#allocation17_spill]] %s3417_s11 }
   0xa   :  { %3438 = sst [smem:[#allocation18_spill]] %s3421_s15 }
   0xb   :  { %3439 = sst [smem:[#allocation19_spill]] %s3422_s16 }
   0xc   :  { %3440 = sst [smem:[#allocation20_spill]] %s3423_s17 }
   0xd LB: > { %3441 = sst [smem:[#allocation2_spill]] %s2879_s24  ;;  %s36_s29 = sadd.s32 1, %s2887_s26  ;;  %s2895_s28 = sphi %s3001_s28, %s27_s28   ;;  %s2891_s27 = sphi %s2999_s27, %s3479_s27   ;;  %s2887_s26 = sphi %s2997_s26, %s3478_s26   ;;  %s2883_s25 = sphi %s2995_s25, %s3477_s25   ;;  %s2879_s24 = sphi %s2993_s24, %s3476_s24  }
   0xe   : > { %3442 = sst [smem:[#allocation3_spill]] %s2887_s26  ;;  %s39_s0 = sadd.s32 1, %s2891_s27 }
   0xf   : > { %3443 = sst [smem:[#allocation4_spill]] %s2891_s27  ;;  %p37_p0 = scmp.ge.s32.totalorder %s36_s29, 2 }
  0x10   : > { %3444 = sst [smem:[#allocation5_spill]] %s2895_s28  ;;  %p2435_p1 = scmp.ge.s32.totalorder %s2895_s28, 1 }
  0x11   : > { %p639_p2 = scmp.lt.s32.totalorder %s2895_s28, 5  ;;  %s3481_s29 = smov (%p37_p0, %s36_s29), 0 }
  0x12   : > { %3445 = sst [smem:[#allocation6_spill]] %s3481_s29  ;;  %s3483_s0 = smov (!%p37_p0, %s39_s0), %s2891_s27 }
  0x13   : > { %p640_p3 = pnand %p2435_p1, %p639_p2  ;;  %p41_p4 = scmp.ge.s32.totalorder %s3483_s0, 2 }
  0x15   : > { %s3485_s0 = smov (%p41_p4, %s3483_s0), 0  ;;  %643 = sbr.rel (%p640_p3) target bundleno = 4147 (0x1033), region = 88 }
  0x16   : > { %3446 = sst [smem:[#allocation7_spill]] %s3485_s0 }
  0x1c   : > { %p751_p5 = scmp.lt.s32.totalorder %s2883_s25, 1  ;;  %p756_p6 = scmp.lt.s32.totalorder %s2879_s24, 1 }
  0x1d   : > { %s3449_s26 = sld [smem:[#allocation9_spill]]  ;;  %s3450_s3 = sld [smem:[#allocation12_spill]] }
  0x1e   : > { %s3487_s25 = smov (!%p751_p5, %s2883_s25), 1  ;;  %s3451_s4 = sld [smem:[#allocation13_spill]] }
  0x1f   : > { %s3027_s30 = scalar_select %p756_p6, %s2879_s24, 1 }
  0x20   : > { %s2711_s18 = smul.u32 24, %s3487_s25  ;;  %s3452_s5 = sld [smem:[#allocation14_spill]] }
  0x21   : > { %s2507_s24 = sshll.u32 %s3027_s30, 4  ;;  %s3454_s9 = sld [smem:[#allocation15_spill]] }
  0x22   : > { %s3088_s17 = scalar_lea.vmem %s3419_s13, %s2507_s24  ;;  %s807_s2 = scalar_lea.vmem %s3420_s14, %s3027_s30 }
  0x23   : > { %s755_s28 = scalar_lea.vmem %s3449_s26, %s2711_s18  ;;  %s3044_s25 = scalar_lea.vmem %s3450_s3, %s2507_s24 }
  0x24   : > { %s3049_s1 = scalar_lea.vmem %s3451_s4, %s2507_s24  ;;  %s3458_s27 = sld [smem:[#allocation18_spill]] }
  0x25   : > { %s3459_s29 = sld [smem:[#allocation20_spill]] }
  0x26   : > { %s3054_s23 = scalar_lea.vmem %s3452_s5, %s2507_s24  ;;  %s3457_s5 = sld [smem:[#allocation19_spill]] }
  0x27   : > { %3453 = sst [smem:[#allocation8_spill]] %s3054_s23  ;;  %s3071_s4 = scalar_lea.vmem %s3454_s9, %s2507_s24 }
  0x28   : > { %s2512_s9 = sshll.u32 %s3027_s30, 6  ;;  %s3460_s24 = sld [smem:[#allocation2_spill]] }
  0x2a   : > { %s3102_s11 = scalar_lea.vmem %s3458_s27, %s2512_s9 }
  0x2b   : > { %s3107_s15 = scalar_lea.vmem %s3459_s29, %s2711_s18 }
  0x2c   : > { %s815_s10 = scalar_lea.vmem %s3457_s5, %s3027_s30 }
  0x2e   : > { %p2450_p7 = scmp.ne.s32.totalorder %s3460_s24, 0 }
  0x2f   : > { %v826_v0 = vld [vmem:[%s755_s28] sm:$0xff] (!%p2450_p7)  ;;  %vm829_vm0 = vcmask (!%p2450_p7), 261120   ;;  %v827_v1 = vld [vmem:[%s755_s28 + $0x8] sm:$0xff] (!%p2450_p7)  ;;  %v828_v2 = vld [vmem:[%s755_s28 + $0x10] sm:$0xff] (!%p2450_p7) }
  0x30   : > { %825 = sbr.rel (%p2450_p7) target bundleno = 55 (0x37), region = 92  ;;  %830 = vst.msk [vmem:[%s3107_s15] sm:$0xff] (!%p2450_p7), %vm829_vm0, %v826_v0  ;;  %831 = vst.msk [vmem:[%s3107_s15 + $0x8] sm:$0xff] (!%p2450_p7), %vm829_vm0, %v827_v1 }
  0x31   : > { %832 = vst.msk [vmem:[%s3107_s15 + $0x10] sm:$0xff] (!%p2450_p7), %vm829_vm0, %v828_v2 }
  0x37 PF: > { %v3114_v3 = vld [vmem:[%s3107_s15] sm:$0xff]  ;;  %vm838_vm1 = vcmask 261120   ;;  %v3120_v5 = vld [vmem:[%s3107_s15 + $0x8] sm:$0xff]  ;;  %s3461_s28 = sld [smem:[#allocation10_spill]]  ;;  %s3464_s3 = sld [smem:[#allocation11_spill]]  ;;  %vm1124_vm2 = vcmask 64512  }
  0x38   : > { %v3117_v4 = vld [vmem:[%s3107_s15 + $0x10] sm:$0xff]  ;;  %v839_v6 = vsel %vm838_vm1, %v3114_v3, 0.0  ;;  %v842_v8 = vsel %vm838_vm1, %v3120_v5, 0.0  ;;  %v2773_v24 = vld [vmem:[%s3044_s25] sm:$0xff]   ;;  %v2774_v25 = vld [vmem:[%s3044_s25 + $0x8] sm:$0xff]   ;;  %s3463_s25 = sld [smem:[#allocation8_spill]]  ;;  %s3466_s20 = scalar_lea.vmem %s3412_s6, %s3027_s30 }
  0x39   : > { %v845_v7 = vsel %vm838_vm1, %v3117_v4, 0.0  ;;  %840 = vadd.xlane.f32.xlu0 %v839_v6  ;;  %2575 = vmatprep.subr.bf16.mxu0 %v2773_v24  ;;  %v2775_v26 = vld [vmem:[%s3049_s1] sm:$0xff]   ;;  %v2776_v52 = vld [vmem:[%s3049_s1 + $0x8] sm:$0xff]   ;;  %s3467_s0 = scalar_lea.vmem %s3413_s7, %s3027_s30  ;;  %s3468_s24 = scalar_lea.vmem %s3414_s8, %s3027_s30  ;;  %vm1227_vm3 = vcmask 1043456   ;;  %vm1185_vm4 = vcmask 195584   ;;  %vm1819_vm5 = vcmask 130048  }
  0x3a   : > { %846 = vadd.xlane.f32.xlu1 %v845_v7  ;;  %2576 = vmatpush3.bf16.msra.mxu0 %v2773_v24  ;;  %v2453_v56 = vld [vmem:[%s3466_s20] ss:$0 sm:$0xff]  ;;  %s2897_s5 = smov 120   ;;  %s2898_s9 = smov 112  }
  0x3b   : > { %2577 = vmatprep.subr.bf16.mxu0 %v2774_v25  ;;  %v2458_v0 = vld [vmem:[%s3467_s0] ss:$0 sm:$0xff]  ;;  %s2902_s27 = smov 24   ;;  %s3471_s19 = sld [smem:[#allocation17_spill]] }
  0x3c   : > { %s3473_s0 = scalar_lea.vmem %s3418_s12, %s3027_s30 }
  0x3d   : > { %843 = vadd.xlane.f32.xlu0 %v842_v8  ;;  %s3462_s18 = scalar_lea.vmem %s3461_s28, %s3027_s30  ;;  %s3465_s16 = scalar_lea.vmem %s3464_s3, %s3027_s30 }
  0x3e   : > { %2578 = vmatpush3.bf16.msra.mxu0 %v2774_v25  ;;  %v2451_v38 = vld [vmem:[%s3462_s18] ss:$0 sm:$0xff]  ;;  %v2778_v54 = vld [vmem:[%s3463_s25 + $0x8] sm:$0xff]   ;;  %s2899_s28 = smov 104   ;;  %s2900_s18 = smov 8  }
  0x3f   : > { %2583 = vmatprep.subr.bf16.mxu0 %v2775_v26  ;;  %v2452_v44 = vld [vmem:[%s3465_s16] ss:$0 sm:$0xff]  ;;  %s3469_s3 = sld [smem:[#allocation16_spill]] }
  0x40   : > { %v2777_v53 = vld [vmem:[%s3463_s25] sm:$0xff]   ;;  %s2901_s25 = smov 16  }
  0x41   : > { %s3472_s20 = scalar_lea.vmem %s3471_s19, %s3027_s30 }
  0x45   : > { %s3470_s16 = scalar_lea.vmem %s3469_s3, %s3027_s30 }
  0xc6   : > { %v841_v9 = vpop.xlane.xlu0 %840 }
  0xc7   : > { %v847_v10 = vpop.xlane.xlu1 %846  ;;  %v849_v11 = vmul.f32 0.03125, %v841_v9 }
  0xc8   : > { %v851_v12 = vmul.f32 0.03125, %v847_v10 }
  0xc9   : > { %v852_v13 = vsub.f32 %v3114_v3, %v849_v11 }
  0xca   : > { %v854_v14 = vsub.f32 %v3117_v4, %v851_v12  ;;  %v844_v15 = vpop.xlane.xlu0 %843 }
  0xcb   : > { %v850_v16 = vmul.f32 0.03125, %v844_v15  ;;  %v855_v17 = vmul.f32 %v852_v13, %v852_v13 }
  0xcc   : > { %v857_v18 = vmul.f32 %v854_v14, %v854_v14 }
  0xcd   : > { %v853_v19 = vsub.f32 %v3120_v5, %v850_v16  ;;  %v858_v20 = vsel %vm838_vm1, %v855_v17, 0.0 }
  0xce   : > { %859 = vadd.xlane.f32.xlu1 %v858_v20  ;;  %v864_v21 = vsel %vm838_vm1, %v857_v18, 0.0 }
  0xcf   : > { %v856_v22 = vmul.f32 %v853_v19, %v853_v19 }
  0xd1   : > { %v861_v23 = vsel %vm838_vm1, %v856_v22, 0.0 }
  0xd2   : > { %865 = vadd.xlane.f32.xlu1 %v864_v21  ;;  %862 = vadd.xlane.f32.xlu0 %v861_v23 }
 0x15b   : > { %v860_v27 = vpop.xlane.xlu1 %859 }
 0x15c   : > { %v867_v28 = vmul.f32 0.03125, %v860_v27 }
 0x15e   : > { %v870_v29 = vadd.f32 1e-05, %v867_v28 }
 0x15f   : > { %v866_v30 = vpop.xlane.xlu1 %865  ;;  %v863_v31 = vpop.xlane.xlu0 %862 }
 0x160   : > { %2791 = vrsqrt.f32 %v870_v29  ;;  %v869_v32 = vmul.f32 0.03125, %v866_v30  ;;  %v868_v33 = vmul.f32 0.03125, %v863_v31 }
 0x162   : > { %v872_v34 = vadd.f32 1e-05, %v869_v32  ;;  %v871_v35 = vadd.f32 1e-05, %v868_v33 }
 0x164   : > { %2793 = vrsqrt.f32 %v872_v34 }
 0x165   : > { %2795 = vrsqrt.f32 %v871_v35 }
 0x16a   : > { %v2792_v36 = vpop.eup %2791 }
 0x16b   : > { %v876_v37 = vmul.f32 %v2792_v36, %v852_v13 }
 0x16d   : > { %v885_v43 = vmul.f32 %v2451_v38, %v876_v37 }
 0x16e   : > { %v2794_v39 = vpop.eup %2793 }
 0x16f   : > { %v2796_v40 = vpop.eup %2795  ;;  %v878_v41 = vmul.f32 %v2794_v39, %v854_v14  ;;  %v894_v48 = vadd.f32 %v2452_v44, %v885_v43  ;;  %v2463_v14 = vld [vmem:[%s3468_s24] ss:$0 sm:$0xff] }
 0x170   : > { %v877_v42 = vmul.f32 %v2796_v40, %v853_v19 }
 0x171   : > { %v887_v45 = vmul.f32 %v2451_v38, %v878_v41 }
 0x172   : > { %v886_v46 = vmul.f32 %v2451_v38, %v877_v42 }
 0x173   : > { %v896_v47 = vadd.f32 %v2452_v44, %v887_v45 }
 0x174   : > { %v895_v49 = vadd.f32 %v2452_v44, %v886_v46 }
 0x175   : > { %v898_v50 = vpack.c.bf16 %v896_v47, %v896_v47 }
 0x176   : > { %v897_v51 = vpack.c.bf16 %v895_v49, %v894_v48 }
 0x178   : > { %2579 = vmatprep.mubr.msk.bf16.mxu0 %vm838_vm1, %v897_v51 }
 0x179   : > { %2580 = vmatmul.mubr.msk.bf16.vlgmr.msra.gmra.mrb[0].mxu0 %vm838_vm1, %v898_v50 }
 0x17a   : > { %2584 = vmatpush3.bf16.msra.mxu0 %v2775_v26  ;;  %2587 = vmatprep.mubr.msk.bf16.mxu0 %vm838_vm1, %v897_v51 }
 0x17b   : > { %2585 = vmatprep.subr.bf16.mxu0 %v2776_v52 }
 0x17e   : > { %2586 = vmatpush3.bf16.msra.mxu0 %v2776_v52 }
 0x17f   : > { %2591 = vmatprep.subr.bf16.mxu0 %v2777_v53 }
 0x181   : > { %2588 = vmatmul.mubr.msk.bf16.vlgmr.msra.gmra.mrb[4].mxu0 %vm838_vm1, %v898_v50 }
 0x182   : > { %2592 = vmatpush3.bf16.msra.mxu0 %v2777_v53  ;;  %2595 = vmatprep.mubr.msk.bf16.mxu0 %vm838_vm1, %v897_v51 }
 0x183   : > { %2593 = vmatprep.subr.bf16.mxu0 %v2778_v54 }
 0x186   : > { %2594 = vmatpush3.bf16.msra.mxu0 %v2778_v54 }
 0x189   : > { %2596 = vmatmul.mubr.msk.bf16.vlgmr.msra.gmra.mrb[8].mxu0 %vm838_vm1, %v898_v50 }
 0x24c   : > { %v2581_v55 = vpop.f32.mrb[0].mxu0 }
 0x24d   : > { %v962_v57 = vpop.f32.mrb[1].mxu0  ;;  %v971_v24 = vadd.f32 %v2581_v55, %v2453_v56 }
 0x24e   : > { %v2582_v58 = vpop.f32.mrb[2].mxu0  ;;  %v963_v60 = vadd.f32 %v2453_v56, %v962_v57 }
 0x24f   : > { %v965_v59 = vpop.f32.mrb[3].mxu0  ;;  %v3197_v26 = vpack.c.bf16 %v971_v24, %v971_v24 }
 0x250   : > { %v966_v61 = vadd.f32 %v2453_v56, %v965_v59 }
 0x252   : > { %v3161_v62 = vpack.c.bf16 %v966_v61, %v963_v60 }
 0x254   : > { %v2589_v63 = vpop.f32.mrb[4].mxu0  ;;  %2603 = vmatprep.mubr.msk.bf16.mxu1 %vm1124_vm2, %v3161_v62 }
 0x255   : > { %v1035_v1 = vpop.f32.mrb[5].mxu0  ;;  %v1044_v7 = vadd.f32 %v2589_v63, %v2458_v0 }
 0x256   : > { %v2590_v2 = vpop.f32.mrb[6].mxu0  ;;  %v1036_v8 = vadd.f32 %v2458_v0, %v1035_v1 }
 0x257   : > { %v1038_v6 = vpop.f32.mrb[7].mxu0  ;;  %v3172_v11 = vpack.c.bf16 %v1044_v7, %v1044_v7 }
 0x258   : > { %v1039_v9 = vadd.f32 %v2458_v0, %v1038_v6 }
 0x259   : > { %v1135_v23 = vsel %vm1124_vm2, %v3172_v11, 0 }
 0x25a   : > { %v3170_v10 = vpack.c.bf16 %v1039_v9, %v1036_v8 }
 0x25c   : > { %v2597_v12 = vpop.f32.mrb[8].mxu0  ;;  %2699 = vmatprep.subr.msk.bf16.mxu1 %vm1124_vm2, %v3170_v10  ;;  %v1132_v13 = vsel %vm1124_vm2, %v3170_v10, 0 }
 0x25d   : > { %v1108_v15 = vpop.f32.mrb[9].mxu0  ;;  %2600 = vmatpush3.bf16.xpose.msra.mxu1 %v1132_v13  ;;  %v1117_v18 = vadd.f32 %v2597_v12, %v2463_v14 }
 0x25e   : > { %v2598_v16 = vpop.f32.mrb[10].mxu0  ;;  %2700 = vmatprep.subr.msk.bf16.mxu1 %vm1124_vm2, %v3172_v11  ;;  %v1109_v19 = vadd.f32 %v2463_v14, %v1108_v15 }
 0x25f   : > { %v1111_v17 = vpop.f32.mrb[11].mxu0  ;;  %v3187_v22 = vpack.c.bf16 %v1117_v18, %v1117_v18 }
 0x260   : > { %v1112_v20 = vadd.f32 %v2463_v14, %v1111_v17 }
 0x261   : > { %v1229_v25 = vsel %vm1227_vm3, %v3187_v22, 0 }
 0x262   : > { %v3185_v21 = vpack.c.bf16 %v1112_v20, %v1109_v19 }
 0x264   : > { %2607 = vmatprep.subr.bf16.mxu0 %v3185_v21 }
 0x265   : > { %2602 = vmatpush3.bf16.xpose.msra.mxu1 %v1135_v23  ;;  %2608 = vmatpush3.bf16.msra.mxu0 %v3185_v21 }
 0x266   : > { %2701 = vmatprep.subr.msk.bf16.mxu0 %vm1227_vm3, %v3187_v22 }
 0x269   : > { %2610 = vmatpush3.bf16.msra.mxu0 %v1229_v25 }
 0x26c   : > { %2604 = vmatmul.mubr.msk.bf16.vlgmr.msra.gmra.mrb[0].mxu1 %vm1124_vm2, %v3197_v26 }
 0x33f   : > { %v2605_v27 = vpop.f32.mrb[0].mxu1 }
 0x340   : > { %v1171_v28 = vpop.f32.mrb[1].mxu1  ;;  %v1192_v33 = vsel %vm1185_vm4, %v2605_v27, -inf }
 0x341   : > { %v2606_v29 = vpop.f32.mrb[2].mxu1  ;;  %v1186_v30 = vsel %vm1185_vm4, %v1171_v28, -inf }
 0x342   : > { %1187 = vmax.xlane.f32.xlu0 %v1186_v30  ;;  %v1174_v31 = vpop.f32.mrb[3].mxu1 }
 0x343   : > { %v1189_v32 = vsel %vm1185_vm4, %v1174_v31, -inf }
 0x344   : > { %1190 = vmax.xlane.f32.xlu1 %v1189_v32 }
 0x346   : > { %1193 = vmax.xlane.f32.xlu0 %v1192_v33 }
 0x3cf   : > { %v1188_v34 = vpop.xlane.xlu0 %1187 }
 0x3d0   : > { %v1195_v35 = vsub.f32 %v1171_v28, %v1188_v34 }
 0x3d1   : > { %v1191_v36 = vpop.xlane.xlu1 %1190 }
 0x3d2   : > { %v1198_v37 = vmul.f32 1.442695, %v1195_v35  ;;  %v1196_v38 = vsub.f32 %v1174_v31, %v1191_v36 }
 0x3d3   : > { %v1194_v39 = vpop.xlane.xlu0 %1193 }
 0x3d4   : > { %2797 = vpow2.f32 %v1198_v37  ;;  %v1200_v40 = vmul.f32 1.442695, %v1196_v38  ;;  %v1197_v41 = vsub.f32 %v2605_v27, %v1194_v39 }
 0x3d6   : > { %2799 = vpow2.f32 %v1200_v40  ;;  %v1202_v42 = vmul.f32 1.442695, %v1197_v41 }
 0x3d8   : > { %2801 = vpow2.f32 %v1202_v42 }
 0x3de   : > { %v2798_v43 = vpop.eup %2797 }
 0x3df   : > { %v1204_v44 = vsel %vm1185_vm4, %v2798_v43, 0.0 }
 0x3e0   : > { %v2800_v45 = vpop.eup %2799  ;;  %1205 = vadd.xlane.f32.xlu1 %v1204_v44 }
 0x3e1   : > { %v1207_v46 = vsel %vm1185_vm4, %v2800_v45, 0.0 }
 0x3e2   : > { %v2802_v47 = vpop.eup %2801  ;;  %1208 = vadd.xlane.f32.xlu0 %v1207_v46 }
 0x3e3   : > { %v1210_v48 = vsel %vm1185_vm4, %v2802_v47, 0.0 }
 0x3e4   : > { %1211 = vadd.xlane.f32.xlu1 %v1210_v48 }
 0x3f5   : > { %1289 = vrot.lane.b32.xlu1 %v3172_v11, %s2897_s5 }
 0x3f8   : > { %1287 = vrot.lane.b32.xlu0 %v3170_v10, %s2897_s5 }
 0x3f9   : > { %1281 = vrot.lane.b32.xlu1 %v3161_v62, %s2897_s5 }
 0x3fd   : > { %1283 = vrot.lane.b32.xlu1 %v3197_v26, %s2897_s5 }
 0x46d   : > { %v1206_v49 = vpop.xlane.xlu1 %1205 }
 0x46e   : > { %2803 = vrcp.f32 %v1206_v49 }
 0x46f   : > { %v1209_v50 = vpop.xlane.xlu0 %1208 }
 0x470   : > { %2805 = vrcp.f32 %v1209_v50 }
 0x471   : > { %v1212_v51 = vpop.xlane.xlu1 %1211 }
 0x472   : > { %2807 = vrcp.f32 %v1212_v51 }
 0x473   : > { %v1288_v52 = vpop.permute.xlu0 %1287 }
 0x474   : > { %2702 = vmatprep.subr.msk.bf16.mxu0 %vm1124_vm2, %v1288_v52  ;;  %v1298_v63 = vsel %vm1124_vm2, %v1288_v52, 0 }
 0x475   : > { %v1290_v55 = vpop.permute.xlu1 %1289 }
 0x476   : > { %v1301_v1 = vsel %vm1124_vm2, %v1290_v55, 0 }
 0x478   : > { %v2804_v53 = vpop.eup %2803 }
 0x479   : > { %v1216_v56 = vmul.f32 %v2804_v53, %v2798_v43  ;;  %v1282_v0 = vpop.permute.xlu1 %1281 }
 0x47a   : > { %v2806_v54 = vpop.eup %2805 }
 0x47b   : > { %v1217_v57 = vmul.f32 %v2806_v54, %v2800_v45 }
 0x47c   : > { %v2808_v58 = vpop.eup %2807 }
 0x47d   : > { %v1218_v59 = vmul.f32 %v2808_v58, %v2802_v47  ;;  %v1219_v60 = vpack.c.bf16 %v1217_v57, %v1216_v56  ;;  %v1284_v2 = vpop.permute.xlu1 %1283 }
 0x47f   : > { %2611 = vmatprep.mubr.msk.bf16.mxu0 %vm1185_vm4, %v1219_v60  ;;  %v1220_v61 = vpack.c.bf16 %v1218_v59, %v1218_v59 }
 0x481   : > { %2612 = vmatmul.mubr.msk.bf16.vlgmr.msra.gmra.mrb[12].mxu0 %vm1185_vm4, %v1220_v61 }
 0x482   : > { %2616 = vmatpush3.bf16.xpose.msra.mxu0 %v1298_v63  ;;  %2619 = vmatprep.mubr.msk.bf16.mxu0 %vm1124_vm2, %v1282_v0 }
 0x483   : > { %2703 = vmatprep.subr.msk.bf16.mxu0 %vm1124_vm2, %v1290_v55 }
 0x48a   : > { %2618 = vmatpush3.bf16.xpose.msra.mxu0 %v1301_v1 }
 0x491   : > { %2620 = vmatmul.mubr.msk.bf16.vlgmr.msra.gmra.mrb[16].mxu0 %vm1124_vm2, %v1284_v2 }
 0x554   : > { %v3223_v6 = vpop.f32.mrb[12].mxu0 }
 0x555   : > { %v3225_v7 = vpop.f32.mrb[13].mxu0 }
 0x556   : > { %v2614_v8 = vpop.f32.mrb[14].mxu0 }
 0x557   : > { %v3227_v9 = vpop.f32.mrb[15].mxu0 }
 0x564   : > { %v2621_v12 = vpop.f32.mrb[16].mxu0 }
 0x565   : > { %v1337_v13 = vpop.f32.mrb[17].mxu0  ;;  %v1357_v18 = vsel %vm1185_vm4, %v2621_v12, -inf }
 0x566   : > { %v2622_v14 = vpop.f32.mrb[18].mxu0  ;;  %v1351_v15 = vsel %vm1185_vm4, %v1337_v13, -inf }
 0x567   : > { %1352 = vmax.xlane.f32.xlu0 %v1351_v15  ;;  %v1340_v16 = vpop.f32.mrb[19].mxu0 }
 0x568   : > { %v1354_v17 = vsel %vm1185_vm4, %v1340_v16, -inf }
 0x569   : > { %1355 = vmax.xlane.f32.xlu1 %v1354_v17 }
 0x56b   : > { %1358 = vmax.xlane.f32.xlu0 %v1357_v18 }
 0x5f4   : > { %v1353_v19 = vpop.xlane.xlu0 %1352 }
 0x5f5   : > { %v1360_v20 = vsub.f32 %v1337_v13, %v1353_v19 }
 0x5f6   : > { %v1356_v23 = vpop.xlane.xlu1 %1355 }
 0x5f7   : > { %v1363_v24 = vmul.f32 1.442695, %v1360_v20  ;;  %v1361_v25 = vsub.f32 %v1340_v16, %v1356_v23 }
 0x5f8   : > { %v1359_v27 = vpop.xlane.xlu0 %1358 }
 0x5f9   : > { %2809 = vpow2.f32 %v1363_v24  ;;  %v1365_v28 = vmul.f32 1.442695, %v1361_v25  ;;  %v1362_v29 = vsub.f32 %v2621_v12, %v1359_v27 }
 0x5fb   : > { %2811 = vpow2.f32 %v1365_v28  ;;  %v1367_v30 = vmul.f32 1.442695, %v1362_v29 }
 0x5fd   : > { %2813 = vpow2.f32 %v1367_v30 }
 0x603   : > { %v2810_v31 = vpop.eup %2809 }
 0x604   : > { %v1369_v32 = vsel %vm1185_vm4, %v2810_v31, 0.0 }
 0x605   : > { %v2812_v33 = vpop.eup %2811  ;;  %1370 = vadd.xlane.f32.xlu0 %v1369_v32 }
 0x606   : > { %v1372_v36 = vsel %vm1185_vm4, %v2812_v33, 0.0 }
 0x607   : > { %v2814_v34 = vpop.eup %2813 }
 0x608   : > { %v1375_v35 = vsel %vm1185_vm4, %v2814_v34, 0.0 }
 0x609   : > { %1376 = vadd.xlane.f32.xlu1 %v1375_v35  ;;  %1373 = vadd.xlane.f32.xlu0 %v1372_v36 }
 0x61a   : > { %1390 = vrot.lane.b32.xlu1 %v3187_v22, %s2897_s5 }
 0x61e   : > { %1454 = vrot.lane.b32.xlu1 %v3170_v10, %s2898_s9 }
 0x61f   : > { %1388 = vrot.lane.b32.xlu0 %v3185_v21, %s2897_s5 }
 0x622   : > { %1456 = vrot.lane.b32.xlu1 %v3172_v11, %s2898_s9 }
 0x623   : > { %1450 = vrot.lane.b32.xlu0 %v3161_v62, %s2898_s9 }
 0x626   : > { %1452 = vrot.lane.b32.xlu1 %v3197_v26, %s2898_s9 }
 0x692   : > { %v1371_v37 = vpop.xlane.xlu0 %1370 }
 0x693   : > { %2815 = vrcp.f32 %v1371_v37 }
 0x696   : > { %v1374_v38 = vpop.xlane.xlu0 %1373  ;;  %v1377_v39 = vpop.xlane.xlu1 %1376 }
 0x697   : > { %2817 = vrcp.f32 %v1374_v38 }
 0x698   : > { %2819 = vrcp.f32 %v1377_v39 }
 0x69a   : > { %v1389_v40 = vpop.permute.xlu0 %1388  ;;  %v1391_v41 = vpop.permute.xlu1 %1390 }
 0x69b   : > { %2623 = vmatprep.subr.bf16.mxu1 %v1389_v40  ;;  %v1400_v43 = vsel %vm1227_vm3, %v1391_v41, 0 }
 0x69c   : > { %2624 = vmatpush3.bf16.msra.mxu1 %v1389_v40 }
 0x69d   : > { %2704 = vmatprep.subr.msk.bf16.mxu1 %vm1227_vm3, %v1391_v41  ;;  %v2816_v42 = vpop.eup %2815 }
 0x69e   : > { %v1455_v44 = vpop.permute.xlu1 %1454  ;;  %v1381_v47 = vmul.f32 %v2816_v42, %v2810_v31  ;;  %v1451_v52 = vpop.permute.xlu0 %1450 }
 0x69f   : > { %v1465_v53 = vsel %vm1124_vm2, %v1455_v44, 0 }
 0x6a0   : > { %2626 = vmatpush3.bf16.msra.mxu1 %v1400_v43 }
 0x6a1   : > { %v2818_v45 = vpop.eup %2817  ;;  %2705 = vmatprep.subr.msk.bf16.mxu1 %vm1124_vm2, %v1455_v44 }
 0x6a2   : > { %v2820_v46 = vpop.eup %2819  ;;  %v1382_v48 = vmul.f32 %v2818_v45, %v2812_v33  ;;  %v1457_v54 = vpop.permute.xlu1 %1456 }
 0x6a3   : > { %v1383_v49 = vmul.f32 %v2820_v46, %v2814_v34  ;;  %v1468_v55 = vsel %vm1124_vm2, %v1457_v54, 0 }
 0x6a4   : > { %v1384_v50 = vpack.c.bf16 %v1382_v48, %v1381_v47 }
 0x6a5   : > { %v1385_v51 = vpack.c.bf16 %v1383_v49, %v1383_v49 }
 0x6a6   : > { %2627 = vmatprep.mubr.msk.bf16.mxu1 %vm1185_vm4, %v1384_v50  ;;  %v1453_v56 = vpop.permute.xlu1 %1452 }
 0x6a7   : > { %2628 = vmatmul.mubr.msk.bf16.vlgmr.msra.gmra.mrb[4].mxu1 %vm1185_vm4, %v1385_v51 }
 0x6a8   : > { %2635 = vmatprep.mubr.msk.bf16.mxu1 %vm1124_vm2, %v1451_v52 }
 0x6a9   : > { %2632 = vmatpush3.bf16.xpose.msra.mxu1 %v1465_v53 }
 0x6aa   : > { %2706 = vmatprep.subr.msk.bf16.mxu1 %vm1124_vm2, %v1457_v54 }
 0x6b1   : > { %2634 = vmatpush3.bf16.xpose.msra.mxu1 %v1468_v55 }
 0x6b8   : > { %2636 = vmatmul.mubr.msk.bf16.vlgmr.msra.gmra.mrb[8].mxu1 %vm1124_vm2, %v1453_v56 }
 0x77a   : > { %v3257_v57 = vpop.f32.mrb[4].mxu1 }
 0x77b   : > { %v3259_v58 = vpop.f32.mrb[5].mxu1 }
 0x77c   : > { %v2630_v59 = vpop.f32.mrb[6].mxu1 }
 0x77d   : > { %v3261_v60 = vpop.f32.mrb[7].mxu1 }
 0x77e   : > { %v2758_v61 = vpack.i.bf16 %v3261_v60, %v3259_v58 }
 0x78b   : > { %v2637_v63 = vpop.f32.mrb[8].mxu1 }
 0x78c   : > { %v1504_v0 = vpop.f32.mrb[9].mxu1  ;;  %v1524_v13 = vsel %vm1185_vm4, %v2637_v63, -inf }
 0x78d   : > { %v2638_v1 = vpop.f32.mrb[10].mxu1  ;;  %v1518_v2 = vsel %vm1185_vm4, %v1504_v0, -inf }
 0x78e   : > { %1519 = vmax.xlane.f32.xlu0 %v1518_v2  ;;  %v1507_v8 = vpop.f32.mrb[11].mxu1 }
 0x78f   : > { %v1521_v12 = vsel %vm1185_vm4, %v1507_v8, -inf }
 0x790   : > { %1522 = vmax.xlane.f32.xlu1 %v1521_v12 }
 0x792   : > { %1525 = vmax.xlane.f32.xlu0 %v1524_v13 }
 0x81b   : > { %v1520_v14 = vpop.xlane.xlu0 %1519 }
 0x81c   : > { %v1527_v15 = vsub.f32 %v1504_v0, %v1520_v14 }
 0x81d   : > { %v1523_v16 = vpop.xlane.xlu1 %1522 }
 0x81e   : > { %v1530_v17 = vmul.f32 1.442695, %v1527_v15  ;;  %v1528_v18 = vsub.f32 %v1507_v8, %v1523_v16 }
 0x81f   : > { %v1526_v19 = vpop.xlane.xlu0 %1525 }
 0x820   : > { %2821 = vpow2.f32 %v1530_v17  ;;  %v1532_v20 = vmul.f32 1.442695, %v1528_v18  ;;  %v1529_v23 = vsub.f32 %v2637_v63, %v1526_v19 }
 0x822   : > { %2823 = vpow2.f32 %v1532_v20  ;;  %v1534_v24 = vmul.f32 1.442695, %v1529_v23 }
 0x824   : > { %2825 = vpow2.f32 %v1534_v24 }
 0x82a   : > { %v2822_v25 = vpop.eup %2821 }
 0x82b   : > { %v1536_v27 = vsel %vm1185_vm4, %v2822_v25, 0.0 }
 0x82c   : > { %v2824_v28 = vpop.eup %2823  ;;  %1537 = vadd.xlane.f32.xlu0 %v1536_v27 }
 0x82d   : > { %v1539_v31 = vsel %vm1185_vm4, %v2824_v28, 0.0 }
 0x82e   : > { %v2826_v29 = vpop.eup %2825 }
 0x82f   : > { %v1542_v30 = vsel %vm1185_vm4, %v2826_v29, 0.0 }
 0x830   : > { %1543 = vadd.xlane.f32.xlu1 %v1542_v30  ;;  %1540 = vadd.xlane.f32.xlu0 %v1539_v31 }
 0x841   : > { %1555 = vrot.lane.b32.xlu1 %v3187_v22, %s2898_s9 }
 0x845   : > { %1619 = vrot.lane.b32.xlu1 %v3170_v10, %s2899_s28 }
 0x846   : > { %1553 = vrot.lane.b32.xlu0 %v3185_v21, %s2898_s9 }
 0x849   : > { %1621 = vrot.lane.b32.xlu1 %v3172_v11, %s2899_s28 }
 0x84a   : > { %1615 = vrot.lane.b32.xlu0 %v3161_v62, %s2899_s28 }
 0x84d   : > { %1617 = vrot.lane.b32.xlu1 %v3197_v26, %s2899_s28 }
 0x8b9   : > { %v1538_v32 = vpop.xlane.xlu0 %1537 }
 0x8ba   : > { %2827 = vrcp.f32 %v1538_v32 }
 0x8bd   : > { %v1541_v33 = vpop.xlane.xlu0 %1540  ;;  %v1544_v34 = vpop.xlane.xlu1 %1543 }
 0x8be   : > { %2829 = vrcp.f32 %v1541_v33 }
 0x8bf   : > { %2831 = vrcp.f32 %v1544_v34 }
 0x8c1   : > { %v1554_v35 = vpop.permute.xlu0 %1553  ;;  %v1556_v10 = vpop.permute.xlu1 %1555 }
 0x8c2   : > { %2639 = vmatprep.subr.bf16.mxu0 %v1554_v35  ;;  %v1565_v11 = vsel %vm1227_vm3, %v1556_v10, 0 }
 0x8c3   : > { %2640 = vmatpush3.bf16.msra.mxu0 %v1554_v35  ;;  %v2779_v35 = vld [vmem:[%s3071_s4] sm:$0xff]  }
 0x8c4   : > { %2707 = vmatprep.subr.msk.bf16.mxu0 %vm1227_vm3, %v1556_v10  ;;  %v2828_v36 = vpop.eup %2827  ;;  %v2780_v10 = vld [vmem:[%s3071_s4 + $0x8] sm:$0xff]  }
 0x8c5   : > { %v1620_v37 = vpop.permute.xlu1 %1619  ;;  %v1548_v38 = vmul.f32 %v2828_v36, %v2822_v25  ;;  %v1616_v43 = vpop.permute.xlu0 %1615 }
 0x8c6   : > { %v1630_v44 = vsel %vm1124_vm2, %v1620_v37, 0 }
 0x8c7   : > { %2642 = vmatpush3.bf16.msra.mxu0 %v1565_v11 }
 0x8c8   : > { %v2830_v62 = vpop.eup %2829  ;;  %2708 = vmatprep.subr.msk.bf16.mxu0 %vm1124_vm2, %v1620_v37 }
 0x8c9   : > { %v2832_v26 = vpop.eup %2831  ;;  %v1549_v39 = vmul.f32 %v2830_v62, %v2824_v28  ;;  %v1622_v45 = vpop.permute.xlu1 %1621 }
 0x8ca   : > { %v1550_v40 = vmul.f32 %v2832_v26, %v2826_v29  ;;  %v1633_v46 = vsel %vm1124_vm2, %v1622_v45, 0 }
 0x8cb   : > { %v1551_v41 = vpack.c.bf16 %v1549_v39, %v1548_v38 }
 0x8cc   : > { %v1552_v42 = vpack.c.bf16 %v1550_v40, %v1550_v40 }
 0x8cd   : > { %2643 = vmatprep.mubr.msk.bf16.mxu0 %vm1185_vm4, %v1551_v41  ;;  %v1618_v47 = vpop.permute.xlu1 %1617 }
 0x8ce   : > { %2644 = vmatmul.mubr.msk.bf16.vlgmr.msra.gmra.mrb[20].mxu0 %vm1185_vm4, %v1552_v42 }
 0x8cf   : > { %2651 = vmatprep.mubr.msk.bf16.mxu0 %vm1124_vm2, %v1616_v43 }
 0x8d0   : > { %2648 = vmatpush3.bf16.xpose.msra.mxu0 %v1630_v44 }
 0x8d1   : > { %2709 = vmatprep.subr.msk.bf16.mxu0 %vm1124_vm2, %v1622_v45 }
 0x8d8   : > { %2650 = vmatpush3.bf16.xpose.msra.mxu0 %v1633_v46 }
 0x8df   : > { %2652 = vmatmul.mubr.msk.bf16.vlgmr.msra.gmra.mrb[24].mxu0 %vm1124_vm2, %v1618_v47 }
 0x9a1   : > { %v2645_v48 = vpop.f32.mrb[20].mxu0 }
 0x9a2   : > { %v1601_v49 = vpop.f32.mrb[21].mxu0 }
 0x9a3   : > { %v2646_v50 = vpop.f32.mrb[22].mxu0 }
 0x9a4   : > { %v1604_v51 = vpop.f32.mrb[23].mxu0 }
 0x9a5   : > { %v2763_v52 = vpack.i.bf16 %v1604_v51, %v1601_v49 }
 0x9b2   : > { %v2653_v53 = vpop.f32.mrb[24].mxu0 }
 0x9b3   : > { %v1669_v54 = vpop.f32.mrb[25].mxu0  ;;  %v1689_v0 = vsel %vm1185_vm4, %v2653_v53, -inf }
 0x9b4   : > { %v2654_v55 = vpop.f32.mrb[26].mxu0  ;;  %v1683_v56 = vsel %vm1185_vm4, %v1669_v54, -inf }
 0x9b5   : > { %1684 = vmax.xlane.f32.xlu0 %v1683_v56  ;;  %v1672_v59 = vpop.f32.mrb[27].mxu0 }
 0x9b6   : > { %v1686_v63 = vsel %vm1185_vm4, %v1672_v59, -inf }
 0x9b7   : > { %1687 = vmax.xlane.f32.xlu1 %v1686_v63 }
 0x9b9   : > { %1690 = vmax.xlane.f32.xlu0 %v1689_v0 }
 0xa42   : > { %v1685_v1 = vpop.xlane.xlu0 %1684 }
 0xa43   : > { %v1692_v2 = vsub.f32 %v1669_v54, %v1685_v1 }
 0xa44   : > { %v1688_v8 = vpop.xlane.xlu1 %1687 }
 0xa45   : > { %v1695_v12 = vmul.f32 1.442695, %v1692_v2  ;;  %v1693_v13 = vsub.f32 %v1672_v59, %v1688_v8 }
 0xa46   : > { %v1691_v14 = vpop.xlane.xlu0 %1690 }
 0xa47   : > { %2833 = vpow2.f32 %v1695_v12  ;;  %v1697_v15 = vmul.f32 1.442695, %v1693_v13  ;;  %v1694_v16 = vsub.f32 %v2653_v53, %v1691_v14 }
 0xa49   : > { %2835 = vpow2.f32 %v1697_v15  ;;  %v1699_v17 = vmul.f32 1.442695, %v1694_v16 }
 0xa4b   : > { %2837 = vpow2.f32 %v1699_v17 }
 0xa51   : > { %v2834_v18 = vpop.eup %2833 }
 0xa52   : > { %v1701_v19 = vsel %vm1185_vm4, %v2834_v18, 0.0 }
 0xa53   : > { %v2836_v20 = vpop.eup %2835  ;;  %1702 = vadd.xlane.f32.xlu0 %v1701_v19 }
 0xa54   : > { %v1704_v25 = vsel %vm1185_vm4, %v2836_v20, 0.0 }
 0xa55   : > { %v2838_v23 = vpop.eup %2837 }
 0xa56   : > { %v1707_v24 = vsel %vm1185_vm4, %v2838_v23, 0.0 }
 0xa57   : > { %1708 = vadd.xlane.f32.xlu1 %v1707_v24  ;;  %1705 = vadd.xlane.f32.xlu0 %v1704_v25 }
 0xa68   : > { %1720 = vrot.lane.b32.xlu1 %v3187_v22, %s2899_s28 }
 0xa6c   : > { %2759 = vrot.lane.b32.xlu1 %v2758_v61, %s2900_s18 }
 0xa6d   : > { %1718 = vrot.lane.b32.xlu0 %v3185_v21, %s2899_s28 }
 0xa70   : > { %1787 = vrot.lane.b32.xlu1 %v3257_v57, %s2900_s18 }
 0xa71   : > { %2764 = vrot.lane.b32.xlu0 %v2763_v52, %s2901_s25 }
 0xa74   : > { %1799 = vrot.lane.b32.xlu1 %v2645_v48, %s2901_s25 }
 0xae0   : > { %v1703_v27 = vpop.xlane.xlu0 %1702 }
 0xae1   : > { %2839 = vrcp.f32 %v1703_v27 }
 0xae4   : > { %v1706_v28 = vpop.xlane.xlu0 %1705  ;;  %v1709_v29 = vpop.xlane.xlu1 %1708 }
 0xae5   : > { %2841 = vrcp.f32 %v1706_v28 }
 0xae6   : > { %2843 = vrcp.f32 %v1709_v29 }
 0xae8   : > { %v1719_v22 = vpop.permute.xlu0 %1718  ;;  %v1721_v30 = vpop.permute.xlu1 %1720 }
 0xae9   : > { %2655 = vmatprep.subr.bf16.mxu1 %v1719_v22  ;;  %v1730_v57 = vsel %vm1227_vm3, %v1721_v30, 0 }
 0xaea   : > { %2656 = vmatpush3.bf16.msra.mxu1 %v1719_v22 }
 0xaeb   : > { %2710 = vmatprep.subr.msk.bf16.mxu1 %vm1227_vm3, %v1721_v30  ;;  %v2840_v21 = vpop.eup %2839 }
 0xaec   : > { %v1713_v61 = vmul.f32 %v2840_v21, %v2834_v18  ;;  %v2760_v38 = vpop.permute.xlu1 %2759  ;;  %v2765_v40 = vpop.permute.xlu0 %2764 }
 0xaed   : > { %v2762_v41 = vunpack.i.h.bf16 %v2760_v38  ;;  %v2761_v42 = vunpack.i.l.bf16 %v2760_v38  ;;  %v2767_v44 = vunpack.i.h.bf16 %v2765_v40  ;;  %v2766_v45 = vunpack.i.l.bf16 %v2765_v40 }
 0xaee   : > { %2658 = vmatpush3.bf16.msra.mxu1 %v1730_v57 }
 0xaef   : > { %v2842_v58 = vpop.eup %2841  ;;  %2663 = vmatprep.subr.bf16.mxu1 %v2779_v35  ;;  %v1817_v46 = vsel %vm1124_vm2, %v3227_v9, %v2762_v41  ;;  %v1816_v47 = vsel %vm1124_vm2, %v3225_v7, %v2761_v42 }
 0xaf0   : > { %v2844_v60 = vpop.eup %2843  ;;  %v1714_v31 = vmul.f32 %v2842_v58, %v2836_v20  ;;  %v1788_v39 = vpop.permute.xlu1 %1787  ;;  %v1820_v54 = vsel %vm1819_vm5, %v1816_v47, %v2766_v45  ;;  %v1821_v55 = vsel %vm1819_vm5, %v1817_v46, %v2767_v44  ;;  %v2490_v45 = vld [vmem:[%s3473_s0] ss:$0 sm:$0xff] }
 0xaf1   : > { %v1715_v32 = vmul.f32 %v2844_v60, %v2838_v23  ;;  %v1818_v49 = vsel %vm1124_vm2, %v3223_v6, %v1788_v39  ;;  %v2488_v6 = vld [vmem:[%s3470_s16] ss:$0 sm:$0xff] }
 0xaf2   : > { %v1716_v33 = vpack.c.bf16 %v1714_v31, %v1713_v61  ;;  %v2781_v61 = vld [vmem:[%s3088_s17] sm:$0xff]   ;;  %v2782_v31 = vld [vmem:[%s3088_s17 + $0x8] sm:$0xff]  }
 0xaf3   : > { %v1717_v34 = vpack.c.bf16 %v1715_v32, %v1715_v32  ;;  %2671 = vmatprep.subr.bf16.mxu0 %v2781_v61  ;;  %v2489_v39 = vld [vmem:[%s3472_s20] ss:$0 sm:$0xff] }
 0xaf4   : > { %2659 = vmatprep.mubr.msk.bf16.mxu1 %vm1185_vm4, %v1716_v33  ;;  %v1800_v43 = vpop.permute.xlu1 %1799  ;;  %2672 = vmatpush3.bf16.msra.mxu0 %v2781_v61 }
 0xaf5   : > { %2660 = vmatmul.mubr.msk.bf16.vlgmr.msra.gmra.mrb[12].mxu1 %vm1185_vm4, %v1717_v34  ;;  %v1822_v51 = vsel %vm1819_vm5, %v1818_v49, %v1800_v43  ;;  %2673 = vmatprep.subr.bf16.mxu0 %v2782_v31 }
 0xaf6   : > { %2664 = vmatpush3.bf16.msra.mxu1 %v2779_v35 }
 0xaf7   : > { %2665 = vmatprep.subr.bf16.mxu1 %v2780_v10 }
 0xaf8   : > { %2674 = vmatpush3.bf16.msra.mxu0 %v2782_v31 }
 0xafa   : > { %2666 = vmatpush3.bf16.msra.mxu1 %v2780_v10 }
 0xbc8   : > { %v2661_v36 = vpop.f32.mrb[12].mxu1 }
 0xbc9   : > { %1811 = vrot.lane.b32.xlu1 %v2661_v36, %s2902_s27  ;;  %v1766_v11 = vpop.f32.mrb[13].mxu1 }
 0xbca   : > { %v2662_v37 = vpop.f32.mrb[14].mxu1 }
 0xbcb   : > { %v1769_v62 = vpop.f32.mrb[15].mxu1 }
 0xbcc   : > { %v2768_v26 = vpack.i.bf16 %v1769_v62, %v1766_v11 }
 0xbce   : > { %2769 = vrot.lane.b32.xlu0 %v2768_v26, %s2902_s27 }
 0xc3b   : > { %v1812_v48 = vpop.permute.xlu1 %1811 }
 0xc3c   : > { %v1825_v56 = vsel %vm1185_vm4, %v1822_v51, %v1812_v48 }
 0xc3d   : > { %v1827_v7 = vpack.c.bf16 %v1825_v56, %v1825_v56  ;;  %v2786_v56 = vld [vmem:[%s3102_s11 + $0x18] sm:$0xff]  }
 0xc40   : > { %v2770_v50 = vpop.permute.xlu0 %2769 }
 0xc41   : > { %v2772_v52 = vunpack.i.h.bf16 %v2770_v50  ;;  %v2771_v53 = vunpack.i.l.bf16 %v2770_v50 }
 0xc43   : > { %v1823_v59 = vsel %vm1185_vm4, %v1820_v54, %v2771_v53  ;;  %v1824_v9 = vsel %vm1185_vm4, %v1821_v55, %v2772_v52  ;;  %v2783_v53 = vld [vmem:[%s3102_s11] sm:$0xff]   ;;  %v2784_v54 = vld [vmem:[%s3102_s11 + $0x8] sm:$0xff]   ;;  %v2785_v55 = vld [vmem:[%s3102_s11 + $0x10] sm:$0xff]  }
 0xc44   : > { %v1826_v63 = vpack.c.bf16 %v1824_v9, %v1823_v59  ;;  %2679 = vmatprep.subr.bf16.mxu1 %v2783_v53  ;;  %v2787_v59 = vld [vmem:[%s3102_s11 + $0x20] sm:$0xff]   ;;  %v2788_v9 = vld [vmem:[%s3102_s11 + $0x28] sm:$0xff]  }
 0xc46   : > { %2667 = vmatprep.mubr.msk.bf16.mxu1 %vm838_vm1, %v1826_v63  ;;  %v2789_v63 = vld [vmem:[%s3102_s11 + $0x30] sm:$0xff]  }
 0xc47   : > { %2668 = vmatmul.mubr.msk.bf16.vlgmr.msra.gmra.mrb[16].mxu1 %vm838_vm1, %v1827_v7  ;;  %v2790_v7 = vld [vmem:[%s3102_s11 + $0x38] sm:$0xff]  }
 0xc48   : > { %2680 = vmatpush3.bf16.msra.mxu1 %v2783_v53 }
 0xc49   : > { %2681 = vmatprep.subr.bf16.mxu1 %v2784_v54 }
 0xc4c   : > { %2682 = vmatpush3.bf16.msra.mxu1 %v2784_v54 }
 0xc4d   : > { %2683 = vmatprep.subr.bf16.mxu1 %v2785_v55 }
 0xc50   : > { %2684 = vmatpush3.bf16.msra.mxu1 %v2785_v55 }
 0xc51   : > { %2685 = vmatprep.subr.bf16.mxu1 %v2786_v56 }
 0xc54   : > { %2686 = vmatpush3.bf16.msra.mxu1 %v2786_v56 }
 0xc55   : > { %2687 = vmatprep.subr.bf16.mxu1 %v2787_v59 }
 0xc58   : > { %2688 = vmatpush3.bf16.msra.mxu1 %v2787_v59 }
 0xc59   : > { %2689 = vmatprep.subr.bf16.mxu1 %v2788_v9 }
 0xc5c   : > { %2690 = vmatpush3.bf16.msra.mxu1 %v2788_v9 }
 0xc5d   : > { %2691 = vmatprep.subr.bf16.mxu1 %v2789_v63 }
 0xc60   : > { %2692 = vmatpush3.bf16.msra.mxu1 %v2789_v63 }
 0xc61   : > { %2693 = vmatprep.subr.bf16.mxu1 %v2790_v7 }
 0xc64   : > { %2694 = vmatpush3.bf16.msra.mxu1 %v2790_v7 }
 0xd1a   : > { %v2669_v0 = vpop.f32.mrb[16].mxu1 }
 0xd1b   : > { %v1884_v1 = vpop.f32.mrb[17].mxu1  ;;  %v1900_v2 = vadd.f32 %v2669_v0, %v3117_v4  ;;  %v2491_v0 = vld [vmem:[%s807_s2] ss:$0 sm:$0xff] }
 0xd1c   : > { %v1898_v8 = vadd.f32 %v1884_v1, %v3114_v3  ;;  %v2670_v12 = vpop.f32.mrb[18].mxu1 }
 0xd1d   : > { %v1887_v13 = vpop.f32.mrb[19].mxu1  ;;  %v3334_v16 = vadd.f32 %v2488_v6, %v1900_v2 }
 0xd1e   : > { %v3331_v14 = vadd.f32 %v2488_v6, %v1898_v8  ;;  %v1899_v15 = vadd.f32 %v1887_v13, %v3120_v5 }
 0xd1f   : > { %v1919_v3 = vsel %vm838_vm1, %v3334_v16, 0.0 }
 0xd20   : > { %v3336_v17 = vadd.f32 %v2488_v6, %v1899_v15  ;;  %v1913_v18 = vsel %vm838_vm1, %v3331_v14, 0.0 }
 0xd21   : > { %1914 = vadd.xlane.f32.xlu0 %v1913_v18 }
 0xd22   : > { %v1916_v19 = vsel %vm838_vm1, %v3336_v17, 0.0 }
 0xd23   : > { %1917 = vadd.xlane.f32.xlu1 %v1916_v19 }
 0xd25   : > { %1920 = vadd.xlane.f32.xlu0 %v1919_v3 }
 0xdae   : > { %v1915_v4 = vpop.xlane.xlu0 %1914 }
 0xdaf   : > { %v1922_v20 = vmul.f32 0.03125, %v1915_v4 }
 0xdb0   : > { %v1918_v23 = vpop.xlane.xlu1 %1917 }
 0xdb1   : > { %v1925_v5 = vsub.f32 %v3331_v14, %v1922_v20  ;;  %v1923_v24 = vmul.f32 0.03125, %v1918_v23 }
 0xdb2   : > { %v1921_v25 = vpop.xlane.xlu0 %1920 }
 0xdb3   : > { %v1926_v27 = vsub.f32 %v3336_v17, %v1923_v24  ;;  %v1924_v28 = vmul.f32 0.03125, %v1921_v25  ;;  %v1928_v29 = vmul.f32 %v1925_v5, %v1925_v5 }
 0xdb5   : > { %v1927_v22 = vsub.f32 %v3334_v16, %v1924_v28  ;;  %v1931_v30 = vsel %vm838_vm1, %v1928_v29, 0.0  ;;  %v1929_v21 = vmul.f32 %v1926_v27, %v1926_v27 }
 0xdb6   : > { %1932 = vadd.xlane.f32.xlu0 %v1931_v30 }
 0xdb7   : > { %v1930_v57 = vmul.f32 %v1927_v22, %v1927_v22  ;;  %v1934_v60 = vsel %vm838_vm1, %v1929_v21, 0.0 }
 0xdb9   : > { %v1937_v58 = vsel %vm838_vm1, %v1930_v57, 0.0 }
 0xdba   : > { %1938 = vadd.xlane.f32.xlu1 %v1937_v58  ;;  %1935 = vadd.xlane.f32.xlu0 %v1934_v60 }
 0xe43   : > { %v1933_v32 = vpop.xlane.xlu0 %1932 }
 0xe44   : > { %v1940_v33 = vmul.f32 0.03125, %v1933_v32 }
 0xe46   : > { %v1943_v34 = vadd.f32 1e-05, %v1940_v33 }
 0xe47   : > { %v1936_v35 = vpop.xlane.xlu0 %1935  ;;  %v1939_v10 = vpop.xlane.xlu1 %1938 }
 0xe48   : > { %2845 = vrsqrt.f32 %v1943_v34  ;;  %v1941_v36 = vmul.f32 0.03125, %v1936_v35  ;;  %v1942_v11 = vmul.f32 0.03125, %v1939_v10 }
 0xe4a   : > { %v1944_v37 = vadd.f32 1e-05, %v1941_v36  ;;  %v1945_v62 = vadd.f32 1e-05, %v1942_v11 }
 0xe4c   : > { %2847 = vrsqrt.f32 %v1944_v37 }
 0xe4d   : > { %2849 = vrsqrt.f32 %v1945_v62 }
 0xe52   : > { %v2846_v26 = vpop.eup %2845 }
 0xe53   : > { %v1949_v38 = vmul.f32 %v2846_v26, %v1925_v5  ;;  %v2496_v26 = vld [vmem:[%s815_s10] ss:$0 sm:$0xff] }
 0xe55   : > { %v1958_v43 = vmul.f32 %v2489_v39, %v1949_v38 }
 0xe56   : > { %v2848_v40 = vpop.eup %2847 }
 0xe57   : > { %v2850_v41 = vpop.eup %2849  ;;  %v1950_v42 = vmul.f32 %v2848_v40, %v1926_v27  ;;  %v1967_v48 = vadd.f32 %v2490_v45, %v1958_v43 }
 0xe58   : > { %v1951_v44 = vmul.f32 %v2850_v41, %v1927_v22 }
 0xe59   : > { %v1959_v46 = vmul.f32 %v2489_v39, %v1950_v42 }
 0xe5a   : > { %v1960_v47 = vmul.f32 %v2489_v39, %v1951_v44 }
 0xe5b   : > { %v1968_v49 = vadd.f32 %v2490_v45, %v1959_v46 }
 0xe5c   : > { %v1969_v50 = vadd.f32 %v2490_v45, %v1960_v47 }
 0xe5d   : > { %v1970_v51 = vpack.c.bf16 %v1968_v49, %v1967_v48 }
 0xe5e   : > { %v1971_v52 = vpack.c.bf16 %v1969_v50, %v1969_v50 }
 0xe5f   : > { %2675 = vmatprep.mubr.msk.bf16.mxu0 %vm838_vm1, %v1970_v51 }
 0xe60   : > { %2676 = vmatmul.mubr.msk.bf16.vlgmr.msra.gmra.mrb[28].mxu0 %vm838_vm1, %v1971_v52 }
 0xf33   : > { %v2677_v6 = vpop.f32.mrb[28].mxu0 }
 0xf34   : > { %v2044_v1 = vadd.f32 %v2677_v6, %v2491_v0  ;;  %v2035_v2 = vpop.f32.mrb[29].mxu0 }
 0xf35   : > { %v2036_v8 = vadd.f32 %v2491_v0, %v2035_v2  ;;  %v2678_v12 = vpop.f32.mrb[30].mxu0 }
 0xf36   : > { %v2051_v13 = vmul.f32 %v2044_v1, %v2044_v1  ;;  %v2038_v15 = vpop.f32.mrb[31].mxu0 }
 0xf37   : > { %v2049_v18 = vmul.f32 %v2036_v8, %v2036_v8  ;;  %v2039_v19 = vadd.f32 %v2491_v0, %v2038_v15 }
 0xf38   : > { %v2054_v3 = vmul.f32 %v2051_v13, %v2044_v1 }
 0xf39   : > { %v2052_v4 = vmul.f32 %v2049_v18, %v2036_v8  ;;  %v2050_v20 = vmul.f32 %v2039_v19, %v2039_v19 }
 0xf3a   : > { %v2057_v23 = vmul.f32 0.044715, %v2054_v3 }
 0xf3b   : > { %v2055_v5 = vmul.f32 0.044715, %v2052_v4  ;;  %v2053_v24 = vmul.f32 %v2050_v20, %v2039_v19 }
 0xf3c   : > { %v2060_v25 = vadd.f32 %v2057_v23, %v2044_v1 }
 0xf3d   : > { %v2058_v27 = vadd.f32 %v2055_v5, %v2036_v8  ;;  %v2056_v28 = vmul.f32 0.044715, %v2053_v24 }
 0xf3e   : > { %v2063_v29 = vmul.f32 0.7978846, %v2060_v25 }
 0xf3f   : > { %v2061_v22 = vmul.f32 0.7978846, %v2058_v27  ;;  %v2059_v30 = vadd.f32 %v2056_v28, %v2039_v19 }
 0xf40   : > { %2851 = vtanh.f32 %v2063_v29 }
 0xf41   : > { %2853 = vtanh.f32 %v2061_v22  ;;  %v2062_v21 = vmul.f32 0.7978846, %v2059_v30 }
 0xf43   : > { %2855 = vtanh.f32 %v2062_v21 }
 0xf4a   : > { %v2852_v57 = vpop.eup %2851 }
 0xf4b   : > { %v2854_v58 = vpop.eup %2853  ;;  %v2069_v60 = vadd.f32 1.0, %v2852_v57 }
 0xf4c   : > { %v2067_v61 = vadd.f32 1.0, %v2854_v58 }
 0xf4d   : > { %v2856_v31 = vpop.eup %2855  ;;  %v2072_v32 = vmul.f32 0.5, %v2069_v60 }
 0xf4e   : > { %v2068_v33 = vadd.f32 1.0, %v2856_v31  ;;  %v2070_v34 = vmul.f32 0.5, %v2067_v61 }
 0xf4f   : > { %v2075_v10 = vmul.f32 %v2072_v32, %v2044_v1 }
 0xf50   : > { %v2071_v35 = vmul.f32 0.5, %v2068_v33  ;;  %v2073_v36 = vmul.f32 %v2070_v34, %v2036_v8 }
 0xf51   : > { %v2077_v62 = vpack.c.bf16 %v2075_v10, %v2075_v10 }
 0xf52   : > { %v2074_v11 = vmul.f32 %v2071_v35, %v2039_v19 }
 0xf54   : > { %v2076_v37 = vpack.c.bf16 %v2074_v11, %v2073_v36 }
 0xf56   : > { %2695 = vmatprep.mubr.bf16.mxu1 %v2076_v37 }
 0xf57   : > { %2696 = vmatmul.mubr.bf16.vlgmr.msra.gmra.mrb[20].mxu1 %v2077_v62 }
0x102a   : > { %v2697_v38 = vpop.f32.mrb[20].mxu1 }
0x102b   : > { %v2192_v39 = vadd.f32 %v2697_v38, %v2496_v26  ;;  %v2183_v40 = vpop.f32.mrb[21].mxu1 }
0x102c   : > { %v2184_v41 = vadd.f32 %v2496_v26, %v2183_v40  ;;  %v2698_v42 = vpop.f32.mrb[22].mxu1 }
0x102d   : > { %v2199_v43 = vadd.f32 %v2192_v39, %v3334_v16  ;;  %v2186_v44 = vpop.f32.mrb[23].mxu1 }
0x102e   : > { %v2197_v45 = vadd.f32 %v2184_v41, %v3331_v14  ;;  %v2187_v46 = vadd.f32 %v2496_v26, %v2186_v44 }
0x102f   : > { %2202 = vst.msk [vmem:[%s3107_s15 + $0x10] sm:$0xff] %vm838_vm1, %v2199_v43 }
0x1030   : > { %2200 = vst.msk [vmem:[%s3107_s15] sm:$0xff] %vm838_vm1, %v2197_v45  ;;  %v2198_v47 = vadd.f32 %v2187_v46, %v3336_v17 }
0x1032   : > { %2201 = vst.msk [vmem:[%s3107_s15 + $0x8] sm:$0xff] %vm838_vm1, %v2198_v47 }
0x1033 PF: > { %s3475_s10 = sld [smem:[#allocation5_spill]]  ;;  %s3476_s24 = sld [smem:[#allocation3_spill]] }
0x1034   : > { %s3477_s25 = sld [smem:[#allocation4_spill]]  ;;  %s3478_s26 = sld [smem:[#allocation6_spill]] }
0x1035   : > { %s3479_s27 = sld [smem:[#allocation7_spill]] }
0x1039   : > { %s27_s28 = sadd.s32 1, %s3475_s10  }
0x103a   : > { %p24_p8 = scmp.ge.s32.totalorder %s27_s28, 6  }
0x103c   :  { %26 = sbr.rel (!%p24_p8) target bundleno = 13 (0xd), region = 170 }

</bundles_post_ra>
